<compile_context>
chip_gen: v6e
topology: v6e:2x2x1
jax: 0.10.0
libtpu: 0.0.40
codegen_flags: <defaults>
</compile_context>

<pallas_src>
import functools

import jax
import jax.numpy as jnp
from jax import lax
from jax.experimental import pallas as pl
from jax.experimental.pallas import tpu as pltpu

EPS = 1e-5
VMEM_LIMIT_BYTES = 48 * 1024 * 1024

# Stage configs from NewFormerBackbone (patch size, width, depth, heads, head dim, mlp dim).
STAGES = (
    dict(patch=4,  dim=96,  depth=2, heads=6,  dim_head=64, mlp=96),
    dict(patch=8,  dim=192, depth=4, heads=8,  dim_head=64, mlp=192),
    dict(patch=16, dim=384, depth=6, heads=12, dim_head=64, mlp=384),
    dict(patch=32, dim=768, depth=8, heads=16, dim_head=64, mlp=768),
)

# dot_general contracting the last dim of lhs with the last dim of rhs (A @ B^T).
_DN_NT = (((1,), (1,)), ((), ()))


def _ln(x, g, b, eps=EPS):
    """LayerNorm over the last dim with one-pass variance (E[x^2] - mu^2)."""
    mu = jnp.mean(x, axis=-1, keepdims=True)
    var = jnp.mean(x * x, axis=-1, keepdims=True) - mu * mu
    return (x - mu) * lax.rsqrt(var + eps) * g + b


# ----------------------------------------------------------------------------
# Kernels
# ----------------------------------------------------------------------------
def _patch_embed_kernel(xp_ref, g1_ref, b1_ref, w_ref, bias_ref, g2_ref, b2_ref,
                        pos_ref, o_ref, *, eps):
    xp = xp_ref[0]                                                   # (N, P) f32
    xn = _ln(xp, g1_ref[...], b1_ref[...], eps).astype(jnp.bfloat16)
    # y = LN(patch) @ W^T + bias    (W kept in PyTorch (out,in) layout)
    y = lax.dot_general(xn, w_ref[...], _DN_NT,
                        preferred_element_type=jnp.float32) + bias_ref[...]
    yn = _ln(y, g2_ref[...], b2_ref[...], eps)
    o_ref[0] = yn + pos_ref[...]


def _attn_block_kernel(x_ref, g_ref, b_ref, wq_ref, wk_ref, wv_ref, wo_ref,
                       o_ref, acc_ref, *, heads, q_tile, seq_len, eps):
    """Pre-LN multi-head attention block with residual: out = x + MHA(LN(x)).

    x_ref:            (1, N, D) f32, full sequence (K/V source + residual rows)
    wq/wk/wv/wo_ref:  (H, dh, D) bf16, head-blocked; softmax scale folded into wq
    o_ref:            (1, TQ, D) f32 query-tile output block
    acc_ref:          (TQ, D) f32 VMEM scratch accumulator over heads
    """
    x_full = x_ref[0]                                                # (N, D) f32
    g = g_ref[...]
    b = b_ref[...]
    xn_kv = _ln(x_full, g, b, eps).astype(jnp.bfloat16)              # (N, D) bf16

    if q_tile == seq_len:
        # Single query tile: reuse the full-sequence LayerNorm.
        x_q = x_full
        xn_q = xn_kv
    else:
        q_start = pl.multiple_of(pl.program_id(1) * q_tile, q_tile)
        x_q = x_ref[0, pl.ds(q_start, q_tile), :]                    # (TQ, D) f32
        xn_q = _ln(x_q, g, b, eps).astype(jnp.bfloat16)

    acc_ref[...] = jnp.zeros_like(acc_ref)

    @pl.loop(0, heads)
    def _per_head(h):
        wq = wq_ref[h]                                               # (dh, D) bf16
        wk = wk_ref[h]
        wv = wv_ref[h]
        wo = wo_ref[h]
        # Projections: contract D (last dim of both) -> no transposes needed.
        q = lax.dot_general(xn_q, wq, _DN_NT,
                            preferred_element_type=jnp.float32).astype(jnp.bfloat16)
        k = lax.dot_general(xn_kv, wk, _DN_NT,
                            preferred_element_type=jnp.float32).astype(jnp.bfloat16)
        v = lax.dot_general(xn_kv, wv, _DN_NT,
                            preferred_element_type=jnp.float32).astype(jnp.bfloat16)
        # Scores: q @ k^T (scale already folded into wq on the host).
        s = lax.dot_general(q, k, _DN_NT,
                            preferred_element_type=jnp.float32)      # (TQ, N) f32
        s = s - jnp.max(s, axis=-1, keepdims=True)
        e = jnp.exp(s)
        p = (e * pl.reciprocal(jnp.sum(e, axis=-1, keepdims=True),
                               approx=True)).astype(jnp.bfloat16)
        oh = jnp.dot(p, v, preferred_element_type=jnp.float32).astype(jnp.bfloat16)
        # Per-head output projection accumulated into scratch (no concat).
        acc_ref[...] += jnp.dot(oh, wo, preferred_element_type=jnp.float32)

    o_ref[0] = x_q + acc_ref[...]


def _ffn_kernel(x_ref, g_ref, b_ref, w1_ref, b1_ref, w2_ref, b2_ref, o_ref, *, eps):
    x = x_ref[0]                                                     # (TN, D) f32
    xn = _ln(x, g_ref[...], b_ref[...], eps).astype(jnp.bfloat16)
    h = lax.dot_general(xn, w1_ref[...], _DN_NT,
                        preferred_element_type=jnp.float32) + b1_ref[...]
    # TODO(synk): PyTorch nn.GELU() defaults to the exact erf form; the tanh
    # approximation (<=3e-3 abs deviation) is used for guaranteed Mosaic lowering.
    h = jax.nn.gelu(h, approximate=True).astype(jnp.bfloat16)
    y = lax.dot_general(h, w2_ref[...], _DN_NT,
                        preferred_element_type=jnp.float32) + b2_ref[...]
    o_ref[0] = x + y


def _layernorm_kernel(x_ref, g_ref, b_ref, o_ref, *, eps):
    o_ref[0] = _ln(x_ref[0], g_ref[...], b_ref[...], eps)


# ----------------------------------------------------------------------------
# pallas_call builders (each built once per distinct shape and jitted/reused)
# ----------------------------------------------------------------------------
def _row_tile(n):
    # Query/row tile: keep the working set bounded and give v7x a second
    # parallel grid axis; fall back to full N for short sequences.
    return 128 if (n % 128 == 0 and n > 128) else n


def build_patch_embed_op(B, N, P, D):
    kernel = functools.partial(_patch_embed_kernel, eps=EPS)
    call = pl.pallas_call(
        kernel,
        out_shape=jax.ShapeDtypeStruct((B, N, D), jnp.float32),
        grid_spec=pltpu.PrefetchScalarGridSpec(
            num_scalar_prefetch=0,
            grid=(B,),
            in_specs=[
                pl.BlockSpec((1, N, P), lambda b: (b, 0, 0)),   # patches
                pl.BlockSpec((1, P), lambda b: (0, 0)),         # LN1 gamma
                pl.BlockSpec((1, P), lambda b: (0, 0)),         # LN1 beta
                pl.BlockSpec((D, P), lambda b: (0, 0)),         # W (torch (out,in)) bf16
                pl.BlockSpec((1, D), lambda b: (0, 0)),         # bias
                pl.BlockSpec((1, D), lambda b: (0, 0)),         # LN2 gamma
                pl.BlockSpec((1, D), lambda b: (0, 0)),         # LN2 beta
                pl.BlockSpec((N, D), lambda b: (0, 0)),         # pos embedding
            ],
            out_specs=pl.BlockSpec((1, N, D), lambda b: (b, 0, 0)),
        ),
        compiler_params=pltpu.CompilerParams(
            dimension_semantics=("parallel",),
            vmem_limit_bytes=VMEM_LIMIT_BYTES),
    )
    return jax.jit(call)


def build_attention_op(B, N, D, heads, dim_head):
    dh = dim_head
    TQ = _row_tile(N)
    kernel = functools.partial(_attn_block_kernel, heads=heads, q_tile=TQ,
                               seq_len=N, eps=EPS)
    call = pl.pallas_call(
        kernel,
        out_shape=jax.ShapeDtypeStruct((B, N, D), jnp.float32),
        grid_spec=pltpu.PrefetchScalarGridSpec(
            num_scalar_prefetch=0,
            grid=(B, N // TQ),
            in_specs=[
                pl.BlockSpec((1, N, D), lambda b, q: (b, 0, 0)),        # x (full seq)
                pl.BlockSpec((1, D), lambda b, q: (0, 0)),              # LN gamma
                pl.BlockSpec((1, D), lambda b, q: (0, 0)),              # LN beta
                pl.BlockSpec((heads, dh, D), lambda b, q: (0, 0, 0)),   # Wq (scale folded)
                pl.BlockSpec((heads, dh, D), lambda b, q: (0, 0, 0)),   # Wk
                pl.BlockSpec((heads, dh, D), lambda b, q: (0, 0, 0)),   # Wv
                pl.BlockSpec((heads, dh, D), lambda b, q: (0, 0, 0)),   # Wo
            ],
            out_specs=pl.BlockSpec((1, TQ, D), lambda b, q: (b, q, 0)),
            scratch_shapes=[pltpu.VMEM((TQ, D), jnp.float32)],
        ),
        compiler_params=pltpu.CompilerParams(
            dimension_semantics=("parallel", "parallel"),
            vmem_limit_bytes=VMEM_LIMIT_BYTES),
    )
    return jax.jit(call)


def build_ffn_op(B, N, D, hidden):
    TN = _row_tile(N)
    kernel = functools.partial(_ffn_kernel, eps=EPS)
    call = pl.pallas_call(
        kernel,
        out_shape=jax.ShapeDtypeStruct((B, N, D), jnp.float32),
        grid_spec=pltpu.PrefetchScalarGridSpec(
            num_scalar_prefetch=0,
            grid=(B, N // TN),
            in_specs=[
                pl.BlockSpec((1, TN, D), lambda b, t: (b, t, 0)),   # x tile
                pl.BlockSpec((1, D), lambda b, t: (0, 0)),          # LN gamma
                pl.BlockSpec((1, D), lambda b, t: (0, 0)),          # LN beta
                pl.BlockSpec((hidden, D), lambda b, t: (0, 0)),     # W1 (torch) bf16
                pl.BlockSpec((1, hidden), lambda b, t: (0, 0)),     # b1
                pl.BlockSpec((D, hidden), lambda b, t: (0, 0)),     # W2 (torch) bf16
                pl.BlockSpec((1, D), lambda b, t: (0, 0)),          # b2
            ],
            out_specs=pl.BlockSpec((1, TN, D), lambda b, t: (b, t, 0)),
        ),
        compiler_params=pltpu.CompilerParams(
            dimension_semantics=("parallel", "parallel"),
            vmem_limit_bytes=VMEM_LIMIT_BYTES),
    )
    return jax.jit(call)


def build_norm_op(B, N, D):
    kernel = functools.partial(_layernorm_kernel, eps=EPS)
    call = pl.pallas_call(
        kernel,
        out_shape=jax.ShapeDtypeStruct((B, N, D), jnp.float32),
        grid_spec=pltpu.PrefetchScalarGridSpec(
            num_scalar_prefetch=0,
            grid=(B,),
            in_specs=[
                pl.BlockSpec((1, N, D), lambda b: (b, 0, 0)),
                pl.BlockSpec((1, D), lambda b: (0, 0)),
                pl.BlockSpec((1, D), lambda b: (0, 0)),
            ],
            out_specs=pl.BlockSpec((1, N, D), lambda b: (b, 0, 0)),
        ),
        compiler_params=pltpu.CompilerParams(
            dimension_semantics=("parallel",),
            vmem_limit_bytes=VMEM_LIMIT_BYTES),
    )
    return jax.jit(call)


def build_stage_ops(B, image_hw, st):
    patch, dim, heads, dh = st["patch"], st["dim"], st["heads"], st["dim_head"]
    n = (image_hw[0] // patch) * (image_hw[1] // patch)
    pdim = 3 * patch * patch
    return dict(
        embed=build_patch_embed_op(B, n, pdim, dim),
        attn=build_attention_op(B, n, dim, heads, dh),
        ff=build_ffn_op(B, n, dim, st["mlp"]),
        norm=build_norm_op(B, n, dim),
    )


# ----------------------------------------------------------------------------
# Host-side helpers (layout-only work, no heavy compute)
# ----------------------------------------------------------------------------
def patchify(x, p):
    """einops 'b c (h p1) (w p2) -> b (h w) (p1 p2 c)' as reshape/transpose."""
    B, C, H, W = x.shape
    h, w = H // p, W // p
    x = x.reshape(B, C, h, p, w, p)
    x = x.transpose(0, 2, 4, 3, 5, 1)            # (B, h, w, p1, p2, C)
    return x.reshape(B, h * w, p * p * C)


def posemb_sincos_2d(h, w, dim, temperature=10000.0):
    y, x = jnp.meshgrid(jnp.arange(h), jnp.arange(w), indexing="ij")
    assert dim % 4 == 0, "feature dimension must be multiple of 4 for sincos emb"
    omega = jnp.arange(dim // 4, dtype=jnp.float32) / (dim // 4 - 1)
    omega = 1.0 / (temperature ** omega)
    yy = y.reshape(-1)[:, None] * omega[None, :]
    xx = x.reshape(-1)[:, None] * omega[None, :]
    pe = jnp.concatenate([jnp.sin(xx), jnp.cos(xx), jnp.sin(yy), jnp.cos(yy)], axis=1)
    return pe.astype(jnp.float32)


# ----------------------------------------------------------------------------
# Parameter init: weights generated in PyTorch (out_features, in_features)
# layout, then repacked into the kernel layout (head-blocked, bf16, scale folded).
# ----------------------------------------------------------------------------
def init_stage_params(key, st, image_hw):
    patch, dim, depth = st["patch"], st["dim"], st["depth"]
    heads, dh, mlp = st["heads"], st["dim_head"], st["mlp"]
    pdim = 3 * patch * patch
    inner = heads * dh
    scale = dh ** (-0.5)
    gh, gw = image_hw[0] // patch, image_hw[1] // patch

    keys = list(jax.random.split(key, 8 + depth * 10))
    ki = iter(keys)

    def nrm(k, shape, s):
        return jax.random.normal(k, shape, jnp.float32) * s

    def ln_init(kg, kb, d):
        return (1.0 + 0.1 * nrm(kg, (d,), 1.0), 0.1 * nrm(kb, (d,), 1.0))

    # patch embedding: LN(pdim) -> Linear(pdim->dim) -> LN(dim)
    g1, b1 = ln_init(next(ki), next(ki), pdim)
    w_pe = nrm(next(ki), (dim, pdim), pdim ** -0.5)          # torch (out, in)
    bias_pe = nrm(next(ki), (dim,), 0.02)
    g2, b2 = ln_init(next(ki), next(ki), dim)
    embed = dict(g1=g1.reshape(1, pdim), b1=b1.reshape(1, pdim),
                 w=w_pe.astype(jnp.bfloat16), bias=bias_pe.reshape(1, dim),
                 g2=g2.reshape(1, dim), b2=b2.reshape(1, dim))

    pos = posemb_sincos_2d(gh, gw, dim)

    layers = []
    for _ in range(depth):
        ga, ba = ln_init(next(ki), next(ki), dim)
        w_qkv = nrm(next(ki), (3 * inner, dim), dim ** -0.5)     # torch to_qkv.weight
        w_out = nrm(next(ki), (dim, inner), inner ** -0.5)       # torch to_out.weight
        attn = dict(
            ln_g=ga.reshape(1, dim), ln_b=ba.reshape(1, dim),
            # head-blocked (H, dh, D); softmax scale folded into Wq
            wq=(w_qkv[:inner].reshape(heads, dh, dim) * scale).astype(jnp.bfloat16),
            wk=w_qkv[inner:2 * inner].reshape(heads, dh, dim).astype(jnp.bfloat16),
            wv=w_qkv[2 * inner:].reshape(heads, dh, dim).astype(jnp.bfloat16),
            wo=w_out.T.reshape(heads, dh, dim).astype(jnp.bfloat16),
        )
        gf, bf_ = ln_init(next(ki), next(ki), dim)
        w1 = nrm(next(ki), (mlp, dim), dim ** -0.5)              # torch layout
        w2 = nrm(next(ki), (dim, mlp), mlp ** -0.5)
        b1v = nrm(next(ki), (mlp,), 0.02)
        b2v = nrm(next(ki), (dim,), 0.02)
        ff = dict(ln_g=gf.reshape(1, dim), ln_b=bf_.reshape(1, dim),
                  w1=w1.astype(jnp.bfloat16), b1=b1v.reshape(1, mlp),
                  w2=w2.astype(jnp.bfloat16), b2=b2v.reshape(1, dim))
        layers.append(dict(attn=attn, ff=ff))

    gn, bn = ln_init(next(ki), next(ki), dim)
    return dict(embed=embed, pos=pos, layers=layers,
                norm=dict(g=gn.reshape(1, dim), b=bn.reshape(1, dim)))


def init_params(key, image_hw):
    params = []
    for st in STAGES:
        key, sk = jax.random.split(key)
        params.append(init_stage_params(sk, st, image_hw))
    return params


# ----------------------------------------------------------------------------
# Forward passes
# ----------------------------------------------------------------------------
def newformer_forward(x_img, params, stage_ops):
    outs = []
    for st, sp, ops in zip(STAGES, params, stage_ops):
        xp = patchify(x_img, st["patch"])
        e = sp["embed"]
        t = ops["embed"](xp, e["g1"], e["b1"], e["w"], e["bias"], e["g2"], e["b2"],
                         sp["pos"])
        for layer in sp["layers"]:
            a = layer["attn"]
            t = ops["attn"](t, a["ln_g"], a["ln_b"], a["wq"], a["wk"], a["wv"], a["wo"])
            f = layer["ff"]
            t = ops["ff"](t, f["ln_g"], f["ln_b"], f["w1"], f["b1"], f["w2"], f["b2"])
        n = sp["norm"]
        t = ops["norm"](t, n["g"], n["b"])
        outs.append(t)
    return tuple(outs)


def _reference_forward(x_img, params):
    """Pure-JAX reference mirroring the PyTorch forward (with the same bf16
    matmul-input casts / folded scale as the Pallas kernels)."""
    outs = []
    for st, sp in zip(STAGES, params):
        xp = patchify(x_img, st["patch"])
        e = sp["embed"]
        xn = _ln(xp, e["g1"], e["b1"]).astype(jnp.bfloat16)
        y = jnp.einsum("bnp,dp->bnd", xn, e["w"],
                       preferred_element_type=jnp.float32) + e["bias"]
        t = _ln(y, e["g2"], e["b2"]) + sp["pos"]
        for layer in sp["layers"]:
            a = layer["attn"]
            xnn = _ln(t, a["ln_g"], a["ln_b"]).astype(jnp.bfloat16)
            q = jnp.einsum("bnd,hkd->bhnk", xnn, a["wq"],
                           preferred_element_type=jnp.float32).astype(jnp.bfloat16)
            k = jnp.einsum("bnd,hkd->bhnk", xnn, a["wk"],
                           preferred_element_type=jnp.float32).astype(jnp.bfloat16)
            v = jnp.einsum("bnd,hkd->bhnk", xnn, a["wv"],
                           preferred_element_type=jnp.float32).astype(jnp.bfloat16)
            s = jnp.einsum("bhnk,bhmk->bhnm", q, k,
                           preferred_element_type=jnp.float32)
            s = s - jnp.max(s, axis=-1, keepdims=True)
            p = jnp.exp(s)
            p = (p / jnp.sum(p, axis=-1, keepdims=True)).astype(jnp.bfloat16)
            oh = jnp.einsum("bhnm,bhmk->bhnk", p, v,
                            preferred_element_type=jnp.float32).astype(jnp.bfloat16)
            t = t + jnp.einsum("bhnk,hkd->bnd", oh, a["wo"],
                               preferred_element_type=jnp.float32)
            f = layer["ff"]
            xnf = _ln(t, f["ln_g"], f["ln_b"]).astype(jnp.bfloat16)
            h1 = jnp.einsum("bnd,kd->bnk", xnf, f["w1"],
                            preferred_element_type=jnp.float32) + f["b1"]
            h1 = jax.nn.gelu(h1, approximate=True).astype(jnp.bfloat16)
            t = t + (jnp.einsum("bnk,dk->bnd", h1, f["w2"],
                                preferred_element_type=jnp.float32) + f["b2"])
        n = sp["norm"]
        outs.append(_ln(t, n["g"], n["b"]))
    return tuple(outs)


reference_forward = jax.jit(_reference_forward)


if __name__ == "__main__":
    B = 2
    IMAGE_HW = (64, 64)   # stages see 256 / 64 / 16 / 4 tokens

    root = jax.random.PRNGKey(0)
    k_x, k_p = jax.random.split(root)
    x_img = jax.random.normal(k_x, (B, 3, IMAGE_HW[0], IMAGE_HW[1]), jnp.float32)

    params = init_params(k_p, IMAGE_HW)
    stage_ops = [build_stage_ops(B, IMAGE_HW, st) for st in STAGES]

    outs = jax.block_until_ready(newformer_forward(x_img, params, stage_ops))
    refs = jax.block_until_ready(reference_forward(x_img, params))

    for i, (st, o, r) in enumerate(zip(STAGES, outs, refs)):
        n_tok = (IMAGE_HW[0] // st["patch"]) * (IMAGE_HW[1] // st["patch"])
        assert o.shape == (B, n_tok, st["dim"]), (o.shape, (B, n_tok, st["dim"]))
        err = float(jnp.max(jnp.abs(o - r)))
        assert err < 5e-2, f"stage {i + 1} mismatch vs reference: max abs err {err}"

    print("KERNEL_OK")
</pallas_src>

<mosaic_0001>
module attributes {stable_mosaic.version = 11 : i64} {
  func.func @_patch_embed_kernel(%arg0: i32, %arg1: memref<1x256x48xf32, #tpu.memory_space<vmem>>, %arg2: memref<1x48xf32, #tpu.memory_space<vmem>>, %arg3: memref<1x48xf32, #tpu.memory_space<vmem>>, %arg4: memref<96x48xbf16, #tpu.memory_space<vmem>>, %arg5: memref<1x96xf32, #tpu.memory_space<vmem>>, %arg6: memref<1x96xf32, #tpu.memory_space<vmem>>, %arg7: memref<1x96xf32, #tpu.memory_space<vmem>>, %arg8: memref<256x96xf32, #tpu.memory_space<vmem>>, %arg9: memref<1x256x96xf32, #tpu.memory_space<vmem>>) attributes {dimension_semantics = [#tpu.dimension_semantics<parallel>], iteration_bounds = array<i64: 2>, scalar_prefetch = 0 : i64, scratch_operands = 0 : i64, tpu.core_type = #tpu.core_type<tc>, window_params = [{transform_indices = @transform_0, window_bounds = array<i64: 1, 256, 48>}, {pipeline_mode = #tpu.pipeline_mode<synchronous>, transform_indices = @transform_1, window_bounds = array<i64: 1, 48>}, {pipeline_mode = #tpu.pipeline_mode<synchronous>, transform_indices = @transform_2, window_bounds = array<i64: 1, 48>}, {pipeline_mode = #tpu.pipeline_mode<synchronous>, transform_indices = @transform_3, window_bounds = array<i64: 96, 48>}, {pipeline_mode = #tpu.pipeline_mode<synchronous>, transform_indices = @transform_4, window_bounds = array<i64: 1, 96>}, {pipeline_mode = #tpu.pipeline_mode<synchronous>, transform_indices = @transform_5, window_bounds = array<i64: 1, 96>}, {pipeline_mode = #tpu.pipeline_mode<synchronous>, transform_indices = @transform_6, window_bounds = array<i64: 1, 96>}, {pipeline_mode = #tpu.pipeline_mode<synchronous>, transform_indices = @transform_7, window_bounds = array<i64: 256, 96>}, {transform_indices = @transform_8, window_bounds = array<i64: 1, 256, 96>}]} {
    %c0 = arith.constant 0 : index
    %c0_0 = arith.constant 0 : index
    %c0_1 = arith.constant 0 : index
    %0 = vector.load %arg1[%c0, %c0_0, %c0_1] : memref<1x256x48xf32, #tpu.memory_space<vmem>>, vector<1x256x48xf32>
    %1 = vector.shape_cast %0 : vector<1x256x48xf32> to vector<256x48xf32>
    %c0_2 = arith.constant 0 : index
    %c0_3 = arith.constant 0 : index
    %2 = vector.load %arg2[%c0_2, %c0_3] : memref<1x48xf32, #tpu.memory_space<vmem>>, vector<1x48xf32>
    %c0_4 = arith.constant 0 : index
    %c0_5 = arith.constant 0 : index
    %3 = vector.load %arg3[%c0_4, %c0_5] : memref<1x48xf32, #tpu.memory_space<vmem>>, vector<1x48xf32>
    %cst = arith.constant dense<0.000000e+00> : vector<256xf32>
    %4 = vector.multi_reduction <add>, %1, %cst [1] : vector<256x48xf32> to vector<256xf32>
    %5 = vector.shape_cast %4 : vector<256xf32> to vector<256x1xf32>
    %cst_6 = arith.constant 4.800000e+01 : f32
    %6 = vector.broadcast %cst_6 : f32 to vector<256x1xf32>
    %7 = arith.divf %5, %6 : vector<256x1xf32>
    %8 = arith.mulf %1, %1 : vector<256x48xf32>
    %cst_7 = arith.constant dense<0.000000e+00> : vector<256xf32>
    %9 = vector.multi_reduction <add>, %8, %cst_7 [1] : vector<256x48xf32> to vector<256xf32>
    %10 = vector.shape_cast %9 : vector<256xf32> to vector<256x1xf32>
    %cst_8 = arith.constant 4.800000e+01 : f32
    %11 = vector.broadcast %cst_8 : f32 to vector<256x1xf32>
    %12 = arith.divf %10, %11 : vector<256x1xf32>
    %13 = arith.mulf %7, %7 : vector<256x1xf32>
    %14 = arith.subf %12, %13 : vector<256x1xf32>
    %15 = vector.broadcast %7 : vector<256x1xf32> to vector<256x48xf32>
    %16 = arith.subf %1, %15 : vector<256x48xf32>
    %cst_9 = arith.constant 9.99999974E-6 : f32
    %17 = vector.broadcast %cst_9 : f32 to vector<256x1xf32>
    %18 = arith.addf %14, %17 : vector<256x1xf32>
    %19 = math.rsqrt %18 : vector<256x1xf32>
    %20 = vector.broadcast %19 : vector<256x1xf32> to vector<256x48xf32>
    %21 = arith.mulf %16, %20 : vector<256x48xf32>
    %22 = vector.broadcast %2 : vector<1x48xf32> to vector<256x48xf32>
    %23 = arith.mulf %21, %22 : vector<256x48xf32>
    %24 = vector.broadcast %3 : vector<1x48xf32> to vector<256x48xf32>
    %25 = arith.addf %23, %24 : vector<256x48xf32>
    %26 = arith.truncf %25 : vector<256x48xf32> to vector<256x48xbf16>
    %c0_10 = arith.constant 0 : index
    %c0_11 = arith.constant 0 : index
    %27 = vector.load %arg4[%c0_10, %c0_11] : memref<96x48xbf16, #tpu.memory_space<vmem>>, vector<96x48xbf16>
    %cst_12 = arith.constant dense<0.000000e+00> : vector<256x96xf32>
    %28 = tpu.matmul %26, %27, %cst_12 {dimension_numbers = #tpu.dot_dimension_numbers<[1], [1], [0], [0], [0, 0, 1, 0], [], []>} : vector<256x48xbf16>, vector<96x48xbf16>, vector<256x96xf32> -> vector<256x96xf32>
    %c0_13 = arith.constant 0 : index
    %c0_14 = arith.constant 0 : index
    %29 = vector.load %arg5[%c0_13, %c0_14] : memref<1x96xf32, #tpu.memory_space<vmem>>, vector<1x96xf32>
    %30 = vector.broadcast %29 : vector<1x96xf32> to vector<256x96xf32>
    %31 = arith.addf %28, %30 : vector<256x96xf32>
    %c0_15 = arith.constant 0 : index
    %c0_16 = arith.constant 0 : index
    %32 = vector.load %arg6[%c0_15, %c0_16] : memref<1x96xf32, #tpu.memory_space<vmem>>, vector<1x96xf32>
    %c0_17 = arith.constant 0 : index
    %c0_18 = arith.constant 0 : index
    %33 = vector.load %arg7[%c0_17, %c0_18] : memref<1x96xf32, #tpu.memory_space<vmem>>, vector<1x96xf32>
    %cst_19 = arith.constant dense<0.000000e+00> : vector<256xf32>
    %34 = vector.multi_reduction <add>, %31, %cst_19 [1] : vector<256x96xf32> to vector<256xf32>
    %35 = vector.shape_cast %34 : vector<256xf32> to vector<256x1xf32>
    %cst_20 = arith.constant 9.600000e+01 : f32
    %36 = vector.broadcast %cst_20 : f32 to vector<256x1xf32>
    %37 = arith.divf %35, %36 : vector<256x1xf32>
    %38 = arith.mulf %31, %31 : vector<256x96xf32>
    %cst_21 = arith.constant dense<0.000000e+00> : vector<256xf32>
    %39 = vector.multi_reduction <add>, %38, %cst_21 [1] : vector<256x96xf32> to vector<256xf32>
    %40 = vector.shape_cast %39 : vector<256xf32> to vector<256x1xf32>
    %cst_22 = arith.constant 9.600000e+01 : f32
    %41 = vector.broadcast %cst_22 : f32 to vector<256x1xf32>
    %42 = arith.divf %40, %41 : vector<256x1xf32>
    %43 = arith.mulf %37, %37 : vector<256x1xf32>
    %44 = arith.subf %42, %43 : vector<256x1xf32>
    %45 = vector.broadcast %37 : vector<256x1xf32> to vector<256x96xf32>
    %46 = arith.subf %31, %45 : vector<256x96xf32>
    %cst_23 = arith.constant 9.99999974E-6 : f32
    %47 = vector.broadcast %cst_23 : f32 to vector<256x1xf32>
    %48 = arith.addf %44, %47 : vector<256x1xf32>
    %49 = math.rsqrt %48 : vector<256x1xf32>
    %50 = vector.broadcast %49 : vector<256x1xf32> to vector<256x96xf32>
    %51 = arith.mulf %46, %50 : vector<256x96xf32>
    %52 = vector.broadcast %32 : vector<1x96xf32> to vector<256x96xf32>
    %53 = arith.mulf %51, %52 : vector<256x96xf32>
    %54 = vector.broadcast %33 : vector<1x96xf32> to vector<256x96xf32>
    %55 = arith.addf %53, %54 : vector<256x96xf32>
    %c0_24 = arith.constant 0 : index
    %c0_25 = arith.constant 0 : index
    %56 = vector.load %arg8[%c0_24, %c0_25] : memref<256x96xf32, #tpu.memory_space<vmem>>, vector<256x96xf32>
    %57 = arith.addf %55, %56 : vector<256x96xf32>
    %c0_26 = arith.constant 0 : index
    %c0_27 = arith.constant 0 : index
    %c0_28 = arith.constant 0 : index
    %58 = vector.load %arg9[%c0_26, %c0_27, %c0_28] : memref<1x256x96xf32, #tpu.memory_space<vmem>>, vector<1x256x96xf32>
    %59 = vector.shape_cast %58 : vector<1x256x96xf32> to vector<256x96xf32>
    %60 = vector.shape_cast %57 : vector<256x96xf32> to vector<1x256x96xf32>
    tpu.vector_store %arg9[%c0_26, %c0_27, %c0_28], %60 {strides = array<i32>} : memref<1x256x96xf32, #tpu.memory_space<vmem>>, vector<1x256x96xf32>,
    return
  }
  func.func @transform_0(%arg0: i32) -> (i32, i32, i32) {
    %c0_i32 = arith.constant 0 : i32
    %c0_i32_0 = arith.constant 0 : i32
    %c0_i32_1 = arith.constant 0 : i32
    return %arg0, %c0_i32, %c0_i32_0 : i32, i32, i32
  }
  func.func @transform_1(%arg0: i32) -> (i32, i32) {
    %c0_i32 = arith.constant 0 : i32
    %c0_i32_0 = arith.constant 0 : i32
    %c0_i32_1 = arith.constant 0 : i32
    return %c0_i32, %c0_i32_0 : i32, i32
  }
  func.func @transform_2(%arg0: i32) -> (i32, i32) {
    %c0_i32 = arith.constant 0 : i32
    %c0_i32_0 = arith.constant 0 : i32
    %c0_i32_1 = arith.constant 0 : i32
    return %c0_i32, %c0_i32_0 : i32, i32
  }
  func.func @transform_3(%arg0: i32) -> (i32, i32) {
    %c0_i32 = arith.constant 0 : i32
    %c0_i32_0 = arith.constant 0 : i32
    %c0_i32_1 = arith.constant 0 : i32
    return %c0_i32, %c0_i32_0 : i32, i32
  }
  func.func @transform_4(%arg0: i32) -> (i32, i32) {
    %c0_i32 = arith.constant 0 : i32
    %c0_i32_0 = arith.constant 0 : i32
    %c0_i32_1 = arith.constant 0 : i32
    return %c0_i32, %c0_i32_0 : i32, i32
  }
  func.func @transform_5(%arg0: i32) -> (i32, i32) {
    %c0_i32 = arith.constant 0 : i32
    %c0_i32_0 = arith.constant 0 : i32
    %c0_i32_1 = arith.constant 0 : i32
    return %c0_i32, %c0_i32_0 : i32, i32
  }
  func.func @transform_6(%arg0: i32) -> (i32, i32) {
    %c0_i32 = arith.constant 0 : i32
    %c0_i32_0 = arith.constant 0 : i32
    %c0_i32_1 = arith.constant 0 : i32
    return %c0_i32, %c0_i32_0 : i32, i32
  }
  func.func @transform_7(%arg0: i32) -> (i32, i32) {
    %c0_i32 = arith.constant 0 : i32
    %c0_i32_0 = arith.constant 0 : i32
    %c0_i32_1 = arith.constant 0 : i32
    return %c0_i32, %c0_i32_0 : i32, i32
  }
  func.func @transform_8(%arg0: i32) -> (i32, i32, i32) {
    %c0_i32 = arith.constant 0 : i32
    %c0_i32_0 = arith.constant 0 : i32
    %c0_i32_1 = arith.constant 0 : i32
    return %arg0, %c0_i32, %c0_i32_0 : i32, i32, i32
  }
}

</mosaic_0001>

<bundles_post_ra>
// kernel: tpu_custom_call.1
= control target key start
LH: loop header
LB: loop body
LE: loop exit
PB: predicated region body
PF: predicated region fallthrough
CT: control target
= control target key end

     0   :  { %s2227_s27 = smov 0   ;;  %s3523_s0 = inlined_call_operand.vmem [shape: f32[2,256,48], index: 0, kind: input, shape index: {}]   ;;  %s3524_s1 = inlined_call_operand.vmem [shape: f32[1,48], index: 1, kind: input, shape index: {}]   ;;  %s3525_s2 = inlined_call_operand.vmem [shape: f32[1,48], index: 2, kind: input, shape index: {}]   ;;  %s3526_s3 = inlined_call_operand.vmem [shape: bf16[96,48], index: 3, kind: input, shape index: {}]   ;;  %s3527_s4 = inlined_call_operand.vmem [shape: f32[1,96], index: 4, kind: input, shape index: {}]   ;;  %s3528_s5 = inlined_call_operand.vmem [shape: f32[1,96], index: 5, kind: input, shape index: {}]   ;;  %s3529_s6 = inlined_call_operand.vmem [shape: f32[1,96], index: 6, kind: input, shape index: {}]   ;;  %s3530_s7 = inlined_call_operand.vmem [shape: f32[256,96], index: 7, kind: input, shape index: {}]   ;;  %s3531_s8 = inlined_call_operand.vmem [shape: f32[2,256,96], index: 8, kind: output, shape index: {}]  }
   0x1 LB: > { %s1902_s28 = sadd.s32 4294967295, %s2180_s27   ;;  %p1906_p0 = scmp.ge.s32.totalorder %s2180_s27, 1  ;;  %s2180_s27 = sphi %s2227_s27, %s18_s27  }
   0x2   : > { %p262_p1 = scmp.lt.s32.totalorder %s2180_s27, 3 }
   0x4   : > { %p263_p2 = pnand %p1906_p0, %p262_p1 }
   0x5   : > { %p296_p3 = scmp.lt.s32.totalorder (!%p263_p2), %s1902_s28, 1 }
   0x6   : > { %266 = sbr.rel (%p263_p2) target bundleno = 698 (0x2ba), region = 52 }
   0xb   : > { %s3533_s28 = smov (!%p296_p3, %s1902_s28), 1  ;;  %vm341_vm0 = vcmask 392192   ;;  %v2040_v18 = vld [vmem:[%s3526_s3 + $0x28] sm:$0xff]   ;;  %v2041_v28 = vld [vmem:[%s3526_s3 + $0x20] sm:$0xff]   ;;  %v2042_v40 = vld [vmem:[%s3526_s3 + $0x18] sm:$0xff]   ;;  %vm1193_vm1 = vcmask 785408  }
   0xc   : > { %s1940_s29 = sshll.u32 %s3533_s28, 8  ;;  %2020 = vmatprep.subr.msk.bf16.mxu0 %vm341_vm0, %v2040_v18  ;;  %2021 = vmatprep.subr.msk.bf16.mxu1 %vm341_vm0, %v2040_v18  ;;  %v1028_v27 = vsel %vm341_vm0, %v2040_v18, 0  ;;  %v1025_v37 = vsel %vm341_vm0, %v2041_v28, 0  ;;  %v1022_v47 = vsel %vm341_vm0, %v2042_v40, 0  ;;  %v2043_v50 = vld [vmem:[%s3526_s3 + $0x10] sm:$0xff]   ;;  %v2044_v62 = vld [vmem:[%s3526_s3 + $0x8] sm:$0xff]  }
   0xd   : > { %s2243_s10 = scalar_lea.vmem %s3523_s0, %s1940_s29  ;;  %1965 = vmatpush3.bf16.xpose.msra.mxu0 %v1028_v27  ;;  %2014 = vmatpush3.bf16.xpose.msra.mxu1 %v1028_v27  ;;  %v1019_v57 = vsel %vm341_vm0, %v2043_v50, 0  ;;  %s3135_s18 = scalar_lea.vmem %s3531_s8, %s1940_s29 }
   0xe   : > { %v2246_v0 = vld [vmem:[%s2243_s10 + $0x80] sm:$0xff]  ;;  %v2252_v2 = vld [vmem:[%s2243_s10 + $0x88] sm:$0xff]  ;;  %v2266_v8 = vld [vmem:[%s2243_s10 + $0x18] sm:$0xff]  ;;  %2022 = vmatprep.subr.msk.bf16.mxu0 %vm341_vm0, %v2041_v28  ;;  %2023 = vmatprep.subr.msk.bf16.mxu1 %vm341_vm0, %v2041_v28 }
   0xf   : > { %v2249_v1 = vld [vmem:[%s2243_s10] sm:$0xff]  ;;  %v390_v3 = vsel %vm341_vm0, %v2246_v0, 0.0  ;;  %v2259_v5 = vld [vmem:[%s2243_s10 + $0x8] sm:$0xff]  ;;  %v393_v6 = vsel %vm341_vm0, %v2252_v2, 0.0  ;;  %v2269_v9 = vld [vmem:[%s2243_s10 + $0x10] sm:$0xff]  ;;  %v351_v10 = vsel %vm341_vm0, %v2266_v8, 0.0  ;;  %v488_v21 = vmul.f32 %v2252_v2, %v2252_v2 }
  0x10   : > { %v342_v4 = vsel %vm341_vm0, %v2249_v1, 0.0  ;;  %391 = vadd.xlane.f32.xlu1 %v390_v3  ;;  %v345_v7 = vsel %vm341_vm0, %v2259_v5, 0.0  ;;  %v348_v11 = vsel %vm341_vm0, %v2269_v9, 0.0  ;;  %v2276_v12 = vld [vmem:[%s2243_s10 + $0x98] sm:$0xff]  ;;  %v2279_v13 = vld [vmem:[%s2243_s10 + $0x90] sm:$0xff]  ;;  %v472_v16 = vmul.f32 %v2259_v5, %v2259_v5  ;;  %v2321_v35 = vld [vmem:[%s2243_s10 + $0x28] sm:$0xff] }
  0x11   : > { %343 = vadd.xlane.f32.xlu0 %v342_v4  ;;  %v399_v14 = vsel %vm341_vm0, %v2276_v12, 0.0  ;;  %v396_v15 = vsel %vm341_vm0, %v2279_v13, 0.0  ;;  %v471_v17 = vmul.f32 %v2249_v1, %v2249_v1  ;;  %v487_v22 = vmul.f32 %v2246_v0, %v2246_v0  ;;  %v2324_v36 = vld [vmem:[%s2243_s10 + $0x20] sm:$0xff]  ;;  %v2335_v41 = vld [vmem:[%s2243_s10 + $0xa8] sm:$0xff]  ;;  %v2347_v45 = vld [vmem:[%s2243_s10 + $0x38] sm:$0xff] }
  0x12   : > { %v506_v19 = vsel %vm341_vm0, %v472_v16, 0.0  ;;  %v554_v23 = vsel %vm341_vm0, %v488_v21, 0.0  ;;  %v474_v25 = vmul.f32 %v2266_v8, %v2266_v8  ;;  %v473_v26 = vmul.f32 %v2269_v9, %v2269_v9  ;;  %v2338_v42 = vld [vmem:[%s2243_s10 + $0xa0] sm:$0xff]  ;;  %v2350_v46 = vld [vmem:[%s2243_s10 + $0x30] sm:$0xff]  ;;  %v2361_v51 = vld [vmem:[%s2243_s10 + $0xb8] sm:$0xff] }
  0x13   : > { %v503_v20 = vsel %vm341_vm0, %v471_v17, 0.0  ;;  %v551_v24 = vsel %vm341_vm0, %v487_v22, 0.0  ;;  %v490_v31 = vmul.f32 %v2276_v12, %v2276_v12  ;;  %v489_v32 = vmul.f32 %v2279_v13, %v2279_v13  ;;  %v2364_v52 = vld [vmem:[%s2243_s10 + $0xb0] sm:$0xff]  ;;  %v2045_v16 = vld [vmem:[%s3526_s3] sm:$0xff]   ;;  %v2430_v28 = vld [vmem:[%s2243_s10 + $0x58] sm:$0xff] }
  0x14   : > { %394 = vadd.xlane.f32.xlu1 %v393_v6  ;;  %v512_v29 = vsel %vm341_vm0, %v474_v25, 0.0  ;;  %v509_v30 = vsel %vm341_vm0, %v473_v26, 0.0  ;;  %v357_v38 = vsel %vm341_vm0, %v2321_v35, 0.0  ;;  %v354_v39 = vsel %vm341_vm0, %v2324_v36, 0.0  ;;  %v2423_v25 = vld [vmem:[%s2243_s10 + $0xc0] sm:$0xff] }
  0x15   : > { %346 = vadd.xlane.f32.xlu0 %v345_v7  ;;  %v560_v33 = vsel %vm341_vm0, %v490_v31, 0.0  ;;  %v557_v34 = vsel %vm341_vm0, %v489_v32, 0.0  ;;  %1967 = vmatpush3.bf16.xpose.msra.mxu0 %v1025_v37  ;;  %v405_v43 = vsel %vm341_vm0, %v2335_v41, 0.0  ;;  %v402_v44 = vsel %vm341_vm0, %v2338_v42, 0.0  ;;  %v2440_v32 = vld [vmem:[%s2243_s10 + $0xd8] sm:$0xff] }
  0x16   : > { %2015 = vmatpush3.bf16.xpose.msra.mxu1 %v1025_v37  ;;  %2024 = vmatprep.subr.msk.bf16.mxu0 %vm341_vm0, %v2042_v40  ;;  %v363_v48 = vsel %vm341_vm0, %v2347_v45, 0.0  ;;  %v360_v49 = vsel %vm341_vm0, %v2350_v46, 0.0  ;;  %v411_v53 = vsel %vm341_vm0, %v2361_v51, 0.0  ;;  %v408_v54 = vsel %vm341_vm0, %v2364_v52, 0.0 }
  0x17   : > { %2025 = vmatprep.subr.msk.bf16.mxu1 %vm341_vm0, %v2042_v40  ;;  %v476_v55 = vmul.f32 %v2321_v35, %v2321_v35  ;;  %v475_v56 = vmul.f32 %v2324_v36, %v2324_v36  ;;  %v492_v60 = vmul.f32 %v2335_v41, %v2335_v41  ;;  %v491_v61 = vmul.f32 %v2338_v42, %v2338_v42 }
  0x18   : > { %352 = vadd.xlane.f32.xlu1 %v351_v10  ;;  %v478_v4 = vmul.f32 %v2347_v45, %v2347_v45  ;;  %v477_v6 = vmul.f32 %v2350_v46, %v2350_v46  ;;  %v1016_v7 = vsel %vm341_vm0, %v2044_v62, 0  ;;  %v1013_v21 = vsel %vm341_vm0, %v2045_v16, 0 }
  0x19   : > { %349 = vadd.xlane.f32.xlu0 %v348_v11  ;;  %v518_v58 = vsel %vm341_vm0, %v476_v55, 0.0  ;;  %v515_v59 = vsel %vm341_vm0, %v475_v56, 0.0  ;;  %v566_v63 = vsel %vm341_vm0, %v492_v60, 0.0  ;;  %v563_v3 = vsel %vm341_vm0, %v491_v61, 0.0  ;;  %v2474_v60 = vld [vmem:[%s2243_s10 + $0x68] sm:$0xff]  ;;  %v2477_v61 = vld [vmem:[%s2243_s10 + $0x60] sm:$0xff] }
  0x1a   : > { %v524_v10 = vsel %vm341_vm0, %v478_v4, 0.0  ;;  %v521_v11 = vsel %vm341_vm0, %v477_v6, 0.0  ;;  %v414_v27 = vsel %vm341_vm0, %v2423_v25, 0.0  ;;  %v498_v56 = vmul.f32 %v2440_v32, %v2440_v32  ;;  %v2487_v4 = vld [vmem:[%s2243_s10 + $0xe0] sm:$0xff] }
  0x1c   : > { %400 = vadd.xlane.f32.xlu1 %v399_v14  ;;  %v494_v14 = vmul.f32 %v2361_v51, %v2361_v51 }
  0x1d   : > { %397 = vadd.xlane.f32.xlu0 %v396_v15  ;;  %1969 = vmatpush3.bf16.xpose.msra.mxu0 %v1022_v47  ;;  %v493_v15 = vmul.f32 %v2364_v52, %v2364_v52 }
  0x1e   : > { %2016 = vmatpush3.bf16.xpose.msra.mxu1 %v1022_v47  ;;  %2026 = vmatprep.subr.msk.bf16.mxu0 %vm341_vm0, %v2043_v50  ;;  %v572_v17 = vsel %vm341_vm0, %v494_v14, 0.0  ;;  %v495_v47 = vmul.f32 %v2423_v25, %v2423_v25 }
  0x1f   : > { %2027 = vmatprep.subr.msk.bf16.mxu1 %vm341_vm0, %v2043_v50  ;;  %v569_v18 = vsel %vm341_vm0, %v493_v15, 0.0  ;;  %v482_v50 = vmul.f32 %v2430_v28, %v2430_v28 }
  0x20   : > { %507 = vadd.xlane.f32.xlu1 %v506_v19  ;;  %v2409_v19 = vld [vmem:[%s2243_s10 + $0x48] sm:$0xff] }
  0x21   : > { %504 = vadd.xlane.f32.xlu0 %v503_v20  ;;  %v2412_v20 = vld [vmem:[%s2243_s10 + $0x40] sm:$0xff]  ;;  %v369_v22 = vsel %vm341_vm0, %v2409_v19, 0.0 }
  0x24   : > { %555 = vadd.xlane.f32.xlu1 %v554_v23  ;;  %v366_v23 = vsel %vm341_vm0, %v2412_v20, 0.0 }
  0x25   : > { %552 = vadd.xlane.f32.xlu0 %v551_v24  ;;  %1971 = vmatpush3.bf16.xpose.msra.mxu0 %v1019_v57  ;;  %v2420_v24 = vld [vmem:[%s2243_s10 + $0xc8] sm:$0xff] }
  0x26   : > { %2017 = vmatpush3.bf16.xpose.msra.mxu1 %v1019_v57  ;;  %2028 = vmatprep.subr.msk.bf16.mxu0 %vm341_vm0, %v2044_v62  ;;  %v417_v26 = vsel %vm341_vm0, %v2420_v24, 0.0 }
  0x27   : > { %2029 = vmatprep.subr.msk.bf16.mxu1 %vm341_vm0, %v2044_v62  ;;  %v381_v62 = vsel %vm341_vm0, %v2474_v60, 0.0 }
  0x28   : > { %513 = vadd.xlane.f32.xlu1 %v512_v29  ;;  %v2433_v29 = vld [vmem:[%s2243_s10 + $0x50] sm:$0xff] }
  0x29   : > { %510 = vadd.xlane.f32.xlu0 %v509_v30  ;;  %v375_v30 = vsel %vm341_vm0, %v2430_v28, 0.0  ;;  %v372_v31 = vsel %vm341_vm0, %v2433_v29, 0.0 }
  0x2c   : > { %561 = vadd.xlane.f32.xlu1 %v560_v33  ;;  %v2443_v33 = vld [vmem:[%s2243_s10 + $0xd0] sm:$0xff] }
  0x2d   : > { %558 = vadd.xlane.f32.xlu0 %v557_v34  ;;  %1973 = vmatpush3.bf16.xpose.msra.mxu0 %v1016_v7  ;;  %v423_v34 = vsel %vm341_vm0, %v2440_v32, 0.0  ;;  %v420_v37 = vsel %vm341_vm0, %v2443_v33, 0.0  ;;  %v497_v57 = vmul.f32 %v2443_v33, %v2443_v33 }
  0x2e   : > { %2018 = vmatpush3.bf16.xpose.msra.mxu1 %v1016_v7  ;;  %2030 = vmatprep.subr.msk.bf16.mxu0 %vm341_vm0, %v2045_v16  ;;  %v426_v7 = vsel %vm341_vm0, %v2487_v4, 0.0 }
  0x2f   : > { %2031 = vmatprep.subr.msk.bf16.mxu1 %vm341_vm0, %v2045_v16  ;;  %v2504_v16 = vld [vmem:[%s2243_s10 + $0xf8] sm:$0xff] }
  0x30   : > { %358 = vadd.xlane.f32.xlu1 %v357_v38  ;;  %v480_v38 = vmul.f32 %v2409_v19, %v2409_v19 }
  0x31   : > { %355 = vadd.xlane.f32.xlu0 %v354_v39  ;;  %v479_v39 = vmul.f32 %v2412_v20, %v2412_v20 }
  0x32   : > { %v530_v40 = vsel %vm341_vm0, %v480_v38, 0.0 }
  0x34   : > { %406 = vadd.xlane.f32.xlu1 %v405_v43  ;;  %v527_v43 = vsel %vm341_vm0, %v479_v39, 0.0 }
  0x35   : > { %403 = vadd.xlane.f32.xlu0 %v402_v44  ;;  %1975 = vmatpush3.bf16.xpose.msra.mxu0 %v1013_v21  ;;  %v496_v44 = vmul.f32 %v2420_v24, %v2420_v24 }
  0x36   : > { %2019 = vmatpush3.bf16.xpose.msra.mxu1 %v1013_v21 }
  0x38   : > { %364 = vadd.xlane.f32.xlu1 %v363_v48  ;;  %v578_v48 = vsel %vm341_vm0, %v496_v44, 0.0  ;;  %v502_v44 = vmul.f32 %v2504_v16, %v2504_v16 }
  0x39   : > { %361 = vadd.xlane.f32.xlu0 %v360_v49  ;;  %v575_v49 = vsel %vm341_vm0, %v495_v47, 0.0 }
  0x3c   : > { %412 = vadd.xlane.f32.xlu1 %v411_v53  ;;  %v481_v53 = vmul.f32 %v2433_v29, %v2433_v29 }
  0x3d   : > { %409 = vadd.xlane.f32.xlu0 %v408_v54  ;;  %v536_v54 = vsel %vm341_vm0, %v482_v50, 0.0 }
  0x3e   : > { %v533_v55 = vsel %vm341_vm0, %v481_v53, 0.0 }
  0x40   : > { %519 = vadd.xlane.f32.xlu1 %v518_v58  ;;  %v584_v58 = vsel %vm341_vm0, %v498_v56, 0.0 }
  0x41   : > { %516 = vadd.xlane.f32.xlu0 %v515_v59  ;;  %v581_v59 = vsel %vm341_vm0, %v497_v57, 0.0 }
  0x44   : > { %567 = vadd.xlane.f32.xlu1 %v566_v63  ;;  %v378_v63 = vsel %vm341_vm0, %v2477_v61, 0.0 }
  0x45   : > { %564 = vadd.xlane.f32.xlu0 %v563_v3  ;;  %v2484_v3 = vld [vmem:[%s2243_s10 + $0xe8] sm:$0xff] }
  0x46   : > { %v429_v6 = vsel %vm341_vm0, %v2484_v3, 0.0 }
  0x48   : > { %525 = vadd.xlane.f32.xlu1 %v524_v10  ;;  %v2494_v10 = vld [vmem:[%s2243_s10 + $0x78] sm:$0xff] }
  0x49   : > { %522 = vadd.xlane.f32.xlu0 %v521_v11  ;;  %v2497_v11 = vld [vmem:[%s2243_s10 + $0x70] sm:$0xff]  ;;  %v387_v14 = vsel %vm341_vm0, %v2494_v10, 0.0  ;;  %v486_v38 = vmul.f32 %v2494_v10, %v2494_v10 }
  0x4a   : > { %v384_v15 = vsel %vm341_vm0, %v2497_v11, 0.0  ;;  %v485_v39 = vmul.f32 %v2497_v11, %v2497_v11 }
  0x4c   : > { %573 = vadd.xlane.f32.xlu1 %v572_v17  ;;  %v2507_v17 = vld [vmem:[%s2243_s10 + $0xf0] sm:$0xff] }
  0x4d   : > { %570 = vadd.xlane.f32.xlu0 %v569_v18  ;;  %v435_v18 = vsel %vm341_vm0, %v2504_v16, 0.0  ;;  %v432_v21 = vsel %vm341_vm0, %v2507_v17, 0.0  ;;  %v501_v47 = vmul.f32 %v2507_v17, %v2507_v17 }
  0x50   : > { %370 = vadd.xlane.f32.xlu1 %v369_v22  ;;  %v484_v22 = vmul.f32 %v2474_v60, %v2474_v60 }
  0x51   : > { %367 = vadd.xlane.f32.xlu0 %v366_v23  ;;  %v483_v23 = vmul.f32 %v2477_v61, %v2477_v61 }
  0x54   : > { %418 = vadd.xlane.f32.xlu1 %v417_v26  ;;  %v542_v26 = vsel %vm341_vm0, %v484_v22, 0.0 }
  0x55   : > { %415 = vadd.xlane.f32.xlu0 %v414_v27  ;;  %v539_v27 = vsel %vm341_vm0, %v483_v23, 0.0 }
  0x58   : > { %376 = vadd.xlane.f32.xlu1 %v375_v30  ;;  %v500_v30 = vmul.f32 %v2484_v3, %v2484_v3 }
  0x59   : > { %373 = vadd.xlane.f32.xlu0 %v372_v31  ;;  %v499_v31 = vmul.f32 %v2487_v4, %v2487_v4 }
  0x5c   : > { %424 = vadd.xlane.f32.xlu1 %v423_v34  ;;  %v590_v34 = vsel %vm341_vm0, %v500_v30, 0.0 }
  0x5d   : > { %421 = vadd.xlane.f32.xlu0 %v420_v37  ;;  %v587_v37 = vsel %vm341_vm0, %v499_v31, 0.0 }
  0x60   : > { %531 = vadd.xlane.f32.xlu1 %v530_v40  ;;  %v548_v40 = vsel %vm341_vm0, %v486_v38, 0.0 }
  0x61   : > { %528 = vadd.xlane.f32.xlu0 %v527_v43  ;;  %v545_v43 = vsel %vm341_vm0, %v485_v39, 0.0 }
  0x64   : > { %579 = vadd.xlane.f32.xlu1 %v578_v48  ;;  %v596_v48 = vsel %vm341_vm0, %v502_v44, 0.0 }
  0x65   : > { %576 = vadd.xlane.f32.xlu0 %v575_v49  ;;  %v593_v49 = vsel %vm341_vm0, %v501_v47, 0.0 }
  0x68   : > { %537 = vadd.xlane.f32.xlu1 %v536_v54 }
  0x69   : > { %534 = vadd.xlane.f32.xlu0 %v533_v55 }
  0x6c   : > { %585 = vadd.xlane.f32.xlu1 %v584_v58 }
  0x6d   : > { %582 = vadd.xlane.f32.xlu0 %v581_v59 }
  0x70   : > { %382 = vadd.xlane.f32.xlu1 %v381_v62 }
  0x71   : > { %379 = vadd.xlane.f32.xlu0 %v378_v63 }
  0x74   : > { %430 = vadd.xlane.f32.xlu1 %v429_v6 }
  0x75   : > { %427 = vadd.xlane.f32.xlu0 %v426_v7 }
  0x78   : > { %388 = vadd.xlane.f32.xlu1 %v387_v14 }
  0x79   : > { %385 = vadd.xlane.f32.xlu0 %v384_v15 }
  0x7c   : > { %436 = vadd.xlane.f32.xlu1 %v435_v18 }
  0x7d   : > { %433 = vadd.xlane.f32.xlu0 %v432_v21 }
  0x80   : > { %543 = vadd.xlane.f32.xlu1 %v542_v26 }
  0x81   : > { %540 = vadd.xlane.f32.xlu0 %v539_v27 }
  0x84   : > { %591 = vadd.xlane.f32.xlu1 %v590_v34 }
  0x85   : > { %588 = vadd.xlane.f32.xlu0 %v587_v37 }
  0x88   : > { %549 = vadd.xlane.f32.xlu1 %v548_v40 }
  0x89   : > { %546 = vadd.xlane.f32.xlu0 %v545_v43 }
  0x8c   : > { %597 = vadd.xlane.f32.xlu1 %v596_v48 }
  0x8d   : > { %594 = vadd.xlane.f32.xlu0 %v593_v49 }
  0x99   : > { %v392_v50 = vpop.xlane.xlu1 %391 }
  0x9a   : > { %v344_v53 = vpop.xlane.xlu0 %343  ;;  %v2547_v23 = vmul.f32 0.020833334, %v392_v50 }
  0x9b   : > { %v2537_v58 = vmul.f32 0.020833334, %v344_v53 }
  0x9c   : > { %v647_v44 = vmul.f32 %v2547_v23, %v2547_v23 }
  0x9d   : > { %v395_v54 = vpop.xlane.xlu1 %394  ;;  %v631_v6 = vmul.f32 %v2537_v58, %v2537_v58 }
  0x9e   : > { %v347_v55 = vpop.xlane.xlu0 %346  ;;  %v2543_v15 = vmul.f32 0.020833334, %v395_v54 }
  0x9f   : > { %v2539_v63 = vmul.f32 0.020833334, %v347_v55 }
  0xa0   : > { %v648_v38 = vmul.f32 %v2543_v15, %v2543_v15 }
  0xa1   : > { %v353_v56 = vpop.xlane.xlu1 %352  ;;  %v632_v18 = vmul.f32 %v2539_v63, %v2539_v63 }
  0xa2   : > { %v350_v57 = vpop.xlane.xlu0 %349  ;;  %v2549_v30 = vmul.f32 0.020833334, %v353_v56 }
  0xa3   : > { %v2551_v31 = vmul.f32 0.020833334, %v350_v57 }
  0xa4   : > { %v634_v49 = vmul.f32 %v2549_v30, %v2549_v30 }
  0xa5   : > { %v401_v59 = vpop.xlane.xlu1 %400  ;;  %v633_v56 = vmul.f32 %v2551_v31, %v2551_v31 }
  0xa6   : > { %v398_v62 = vpop.xlane.xlu0 %397  ;;  %v2559_v50 = vmul.f32 0.020833334, %v401_v59 }
  0xa9   : > { %v508_v7 = vpop.xlane.xlu1 %507 }
  0xaa   : > { %v505_v14 = vpop.xlane.xlu0 %504  ;;  %v600_v21 = vmul.f32 0.020833334, %v508_v7 }
  0xab   : > { %v599_v22 = vmul.f32 0.020833334, %v505_v14  ;;  %v2563_v14 = vmul.f32 0.020833334, %v398_v62 }
  0xac   : > { %v664_v26 = vsub.f32 %v600_v21, %v632_v18 }
  0xad   : > { %v663_v27 = vsub.f32 %v599_v22, %v631_v6  ;;  %v556_v34 = vpop.xlane.xlu1 %555 }
  0xae   : > { %v553_v37 = vpop.xlane.xlu0 %552  ;;  %v728_v39 = vadd.f32 1e-05, %v664_v26  ;;  %v616_v43 = vmul.f32 0.020833334, %v556_v34 }
  0xaf   : > { %v727_v40 = vadd.f32 1e-05, %v663_v27  ;;  %v615_v47 = vmul.f32 0.020833334, %v553_v37  ;;  %v650_v27 = vmul.f32 %v2559_v50, %v2559_v50 }
  0xb0   : > { %2046 = vrsqrt.f32 %v728_v39  ;;  %v680_v48 = vsub.f32 %v616_v43, %v648_v38  ;;  %v649_v39 = vmul.f32 %v2563_v14, %v2563_v14 }
  0xb1   : > { %2048 = vrsqrt.f32 %v727_v40  ;;  %v679_v53 = vsub.f32 %v615_v47, %v647_v44  ;;  %v514_v54 = vpop.xlane.xlu1 %513 }
  0xb2   : > { %v511_v55 = vpop.xlane.xlu0 %510  ;;  %v744_v57 = vadd.f32 1e-05, %v680_v48  ;;  %v602_v6 = vmul.f32 0.020833334, %v514_v54 }
  0xb3   : > { %v601_v7 = vmul.f32 0.020833334, %v511_v55  ;;  %v743_v18 = vadd.f32 1e-05, %v679_v53  ;;  %v696_v53 = vsub.f32 %v2259_v5, %v2539_v63  ;;  %v695_v55 = vsub.f32 %v2249_v1, %v2537_v58  ;;  %v2583_v5 = vld [vmem:[%s3525_s2] ss:$0 sm:$0xff] }
  0xb4   : > { %2050 = vrsqrt.f32 %v744_v57  ;;  %v666_v21 = vsub.f32 %v602_v6, %v634_v49  ;;  %v711_v58 = vsub.f32 %v2246_v0, %v2547_v23  ;;  %v697_v0 = vsub.f32 %v2269_v9, %v2551_v31 }
  0xb5   : > { %v665_v22 = vsub.f32 %v601_v7, %v633_v56  ;;  %2052 = vrsqrt.f32 %v743_v18  ;;  %v562_v26 = vpop.xlane.xlu1 %561  ;;  %v2576_v7 = vld [vmem:[%s3524_s1] ss:$0 sm:$0xff]  ;;  %v714_v9 = vsub.f32 %v2276_v12, %v2559_v50  ;;  %v713_v31 = vsub.f32 %v2279_v13, %v2563_v14 }
  0xb6   : > { %v559_v59 = vpop.xlane.xlu0 %558  ;;  %v730_v34 = vadd.f32 1e-05, %v666_v21  ;;  %v618_v38 = vmul.f32 0.020833334, %v562_v26 }
  0xb7   : > { %v729_v37 = vadd.f32 1e-05, %v665_v22  ;;  %v617_v40 = vmul.f32 0.020833334, %v559_v59  ;;  %v712_v22 = vsub.f32 %v2252_v2, %v2543_v15 }
  0xb8   : > { %2054 = vrsqrt.f32 %v730_v34  ;;  %v682_v62 = vsub.f32 %v618_v38, %v650_v27 }
  0xb9   : > { %2056 = vrsqrt.f32 %v729_v37  ;;  %v681_v43 = vsub.f32 %v617_v40, %v649_v39  ;;  %v359_v44 = vpop.xlane.xlu1 %358  ;;  %v698_v39 = vsub.f32 %v2266_v8, %v2549_v30 }
  0xba   : > { %v356_v47 = vpop.xlane.xlu0 %355  ;;  %v746_v48 = vadd.f32 1e-05, %v682_v62  ;;  %v2593_v40 = vmul.f32 0.020833334, %v359_v44 }
  0xbb   : > { %v745_v49 = vadd.f32 1e-05, %v681_v43 }
  0xbc   : > { %2058 = vrsqrt.f32 %v746_v48 }
  0xbd   : > { %v2047_v54 = vpop.eup %2046  ;;  %2060 = vrsqrt.f32 %v745_v49  ;;  %v407_v56 = vpop.xlane.xlu1 %406 }
  0xbe   : > { %v404_v57 = vpop.xlane.xlu0 %403  ;;  %v2049_v6 = vpop.eup %2048  ;;  %v792_v18 = vmul.f32 %v2047_v54, %v696_v53 }
  0xbf   : > { %v791_v21 = vmul.f32 %v2049_v6, %v695_v55  ;;  %v2599_v55 = vmul.f32 0.020833334, %v356_v47  ;;  %v2610_v47 = vmul.f32 0.020833334, %v407_v56  ;;  %v2616_v14 = vmul.f32 0.020833334, %v404_v57 }
  0xc0   : > { %v830_v27 = vmul.f32 %v2576_v7, %v792_v18  ;;  %v636_v18 = vmul.f32 %v2593_v40, %v2593_v40 }
  0xc1   : > { %v2051_v1 = vpop.eup %2050  ;;  %v365_v63 = vpop.xlane.xlu1 %364  ;;  %v829_v59 = vmul.f32 %v2576_v7, %v791_v21  ;;  %v635_v12 = vmul.f32 %v2599_v55, %v2599_v55 }
  0xc2   : > { %v362_v26 = vpop.xlane.xlu0 %361  ;;  %v2053_v34 = vpop.eup %2052  ;;  %v808_v37 = vmul.f32 %v2051_v1, %v712_v22  ;;  %v868_v2 = vadd.f32 %v2583_v5, %v830_v27 }
  0xc3   : > { %v867_v38 = vadd.f32 %v2583_v5, %v829_v59  ;;  %v807_v15 = vmul.f32 %v2053_v34, %v711_v58 }
  0xc4   : > { %v846_v53 = vmul.f32 %v2576_v7, %v808_v37 }
  0xc5   : > { %v2055_v62 = vpop.eup %2054  ;;  %v413_v23 = vpop.xlane.xlu1 %412  ;;  %v899_v48 = vpack.c.bf16 %v868_v2, %v867_v38  ;;  %v845_v49 = vmul.f32 %v2576_v7, %v807_v15  ;;  %v2621_v15 = vmul.f32 0.020833334, %v365_v63 }
  0xc6   : > { %v410_v43 = vpop.xlane.xlu0 %409  ;;  %v2057_v54 = vpop.eup %2056  ;;  %v794_v6 = vmul.f32 %v2055_v62, %v698_v39  ;;  %v884_v30 = vadd.f32 %v2583_v5, %v846_v53 }
  0xc7   : > { %1976 = vmatprep.mubr.msk.bf16.mxu0 %vm341_vm0, %v899_v48  ;;  %v883_v8 = vadd.f32 %v2583_v5, %v845_v49  ;;  %v793_v44 = vmul.f32 %v2057_v54, %v697_v0  ;;  %v652_v48 = vmul.f32 %v2610_v47, %v2610_v47  ;;  %v2626_v49 = vmul.f32 0.020833334, %v362_v26 }
  0xc8   : > { %v832_v27 = vmul.f32 %v2576_v7, %v794_v6  ;;  %v638_v26 = vmul.f32 %v2621_v15, %v2621_v15 }
  0xc9   : > { %v2059_v21 = vpop.eup %2058  ;;  %v520_v22 = vpop.xlane.xlu1 %519  ;;  %v907_v58 = vpack.c.bf16 %v884_v30, %v883_v8  ;;  %v831_v59 = vmul.f32 %v2576_v7, %v793_v44 }
  0xca   : > { %v517_v1 = vpop.xlane.xlu0 %516  ;;  %v2061_v34 = vpop.eup %2060  ;;  %v604_v50 = vmul.f32 0.020833334, %v520_v22  ;;  %v810_v13 = vmul.f32 %v2059_v21, %v714_v9  ;;  %v870_v38 = vadd.f32 %v2583_v5, %v832_v27  ;;  %v651_v9 = vmul.f32 %v2616_v14, %v2616_v14 }
  0xcb   : > { %v603_v37 = vmul.f32 0.020833334, %v517_v1  ;;  %1992 = vmatprep.mubr.msk.bf16.mxu1 %vm341_vm0, %v907_v58  ;;  %v869_v56 = vadd.f32 %v2583_v5, %v831_v59  ;;  %v809_v2 = vmul.f32 %v2061_v34, %v713_v31  ;;  %v2636_v22 = vmul.f32 0.020833334, %v413_v23 }
  0xcc   : > { %v668_v39 = vsub.f32 %v604_v50, %v636_v18  ;;  %v848_v0 = vmul.f32 %v2576_v7, %v810_v13  ;;  %v637_v34 = vmul.f32 %v2626_v49, %v2626_v49  ;;  %v2640_v13 = vmul.f32 0.020833334, %v410_v43 }
  0xcd   : > { %v667_v62 = vsub.f32 %v603_v37, %v635_v12  ;;  %v568_v57 = vpop.xlane.xlu1 %567  ;;  %v900_v54 = vpack.c.bf16 %v870_v38, %v869_v56  ;;  %v847_v6 = vmul.f32 %v2576_v7, %v809_v2 }
  0xce   : > { %v565_v53 = vpop.xlane.xlu0 %564  ;;  %v732_v8 = vadd.f32 1e-05, %v668_v39  ;;  %v620_v44 = vmul.f32 0.020833334, %v568_v57  ;;  %v886_v63 = vadd.f32 %v2583_v5, %v848_v0 }
  0xcf   : > { %v731_v30 = vadd.f32 1e-05, %v667_v62  ;;  %v619_v31 = vmul.f32 0.020833334, %v565_v53  ;;  %1977 = vmatmul.mubr.msk.bf16.vlgmr.msra.gmra.mxu0 %vm341_vm0, %v900_v54  ;;  %v885_v18 = vadd.f32 %v2583_v5, %v847_v6  ;;  %v654_v62 = vmul.f32 %v2636_v22, %v2636_v22 }
  0xd0   : > { %2062 = vrsqrt.f32 %v732_v8  ;;  %v684_v21 = vsub.f32 %v620_v44, %v652_v48  ;;  %v653_v53 = vmul.f32 %v2640_v13, %v2640_v13 }
  0xd1   : > { %2064 = vrsqrt.f32 %v731_v30  ;;  %v683_v1 = vsub.f32 %v619_v31, %v651_v9  ;;  %v526_v58 = vpop.xlane.xlu1 %525  ;;  %v908_v27 = vpack.c.bf16 %v886_v63, %v885_v18  ;;  %v700_v9 = vsub.f32 %v2321_v35, %v2593_v40 }
  0xd2   : > { %v523_v59 = vpop.xlane.xlu0 %522  ;;  %v748_v12 = vadd.f32 1e-05, %v684_v21  ;;  %v606_v50 = vmul.f32 0.020833334, %v526_v58  ;;  %v699_v18 = vsub.f32 %v2324_v36, %v2599_v55 }
  0xd3   : > { %v605_v37 = vmul.f32 0.020833334, %v523_v59  ;;  %v747_v56 = vadd.f32 1e-05, %v683_v1  ;;  %1993 = vmatmul.mubr.msk.bf16.vlgmr.msra.gmra.mxu1 %vm341_vm0, %v908_v27  ;;  %v716_v27 = vsub.f32 %v2335_v41, %v2610_v47  ;;  %v702_v41 = vsub.f32 %v2347_v45, %v2621_v15 }
  0xd4   : > { %2066 = vrsqrt.f32 %v748_v12  ;;  %v670_v38 = vsub.f32 %v606_v50, %v638_v26  ;;  %v715_v12 = vsub.f32 %v2338_v42, %v2616_v14  ;;  %v701_v42 = vsub.f32 %v2350_v46, %v2626_v49 }
  0xd5   : > { %v669_v23 = vsub.f32 %v605_v37, %v637_v34  ;;  %2068 = vrsqrt.f32 %v747_v56  ;;  %v574_v2 = vpop.xlane.xlu1 %573  ;;  %v718_v46 = vsub.f32 %v2361_v51, %v2636_v22  ;;  %v717_v49 = vsub.f32 %v2364_v52, %v2640_v13 }
  0xd6   : > { %v571_v39 = vpop.xlane.xlu0 %570  ;;  %v734_v0 = vadd.f32 1e-05, %v670_v38  ;;  %v622_v57 = vmul.f32 0.020833334, %v574_v2 }
  0xd7   : > { %v733_v48 = vadd.f32 1e-05, %v669_v23  ;;  %v621_v43 = vmul.f32 0.020833334, %v571_v39 }
  0xd8   : > { %2070 = vrsqrt.f32 %v734_v0  ;;  %v686_v54 = vsub.f32 %v622_v57, %v654_v62 }
  0xd9   : > { %2072 = vrsqrt.f32 %v733_v48  ;;  %v685_v6 = vsub.f32 %v621_v43, %v653_v53  ;;  %v371_v8 = vpop.xlane.xlu1 %370 }
  0xda   : > { %v368_v30 = vpop.xlane.xlu0 %367  ;;  %v750_v44 = vadd.f32 1e-05, %v686_v54  ;;  %v2661_v47 = vmul.f32 0.020833334, %v371_v8 }
  0xdb   : > { %v749_v63 = vadd.f32 1e-05, %v685_v6  ;;  %v2667_v53 = vmul.f32 0.020833334, %v368_v30 }
  0xdc   : > { %2074 = vrsqrt.f32 %v750_v44  ;;  %v640_v6 = vmul.f32 %v2661_v47, %v2661_v47 }
  0xdd   : > { %v2063_v31 = vpop.eup %2062  ;;  %2076 = vrsqrt.f32 %v749_v63  ;;  %v419_v26 = vpop.xlane.xlu1 %418  ;;  %v639_v51 = vmul.f32 %v2667_v53, %v2667_v53 }
  0xde   : > { %v416_v21 = vpop.xlane.xlu0 %415  ;;  %v2065_v1 = vpop.eup %2064  ;;  %v796_v58 = vmul.f32 %v2063_v31, %v700_v9  ;;  %v2678_v30 = vmul.f32 0.020833334, %v419_v26 }
  0xdf   : > { %v795_v59 = vmul.f32 %v2065_v1, %v699_v18  ;;  %v2684_v13 = vmul.f32 0.020833334, %v416_v21 }
  0xe0   : > { %v834_v37 = vmul.f32 %v2576_v7, %v796_v58 }
  0xe1   : > { %v2067_v34 = vpop.eup %2066  ;;  %v377_v50 = vpop.xlane.xlu1 %376  ;;  %v833_v40 = vmul.f32 %v2576_v7, %v795_v59 }
  0xe2   : > { %v374_v35 = vpop.xlane.xlu0 %373  ;;  %v2069_v36 = vpop.eup %2068  ;;  %v812_v55 = vmul.f32 %v2067_v34, %v716_v27  ;;  %v872_v38 = vadd.f32 %v2583_v5, %v834_v37  ;;  %v2689_v34 = vmul.f32 0.020833334, %v377_v50 }
  0xe3   : > { %v871_v56 = vadd.f32 %v2583_v5, %v833_v40  ;;  %v811_v23 = vmul.f32 %v2069_v36, %v715_v12  ;;  %v656_v36 = vmul.f32 %v2678_v30, %v2678_v30 }
  0xe4   : > { %v850_v48 = vmul.f32 %v2576_v7, %v812_v55  ;;  %v2694_v55 = vmul.f32 0.020833334, %v374_v35  ;;  %v642_v35 = vmul.f32 %v2689_v34, %v2689_v34 }
  0xe5   : > { %v2071_v2 = vpop.eup %2070  ;;  %v425_v14 = vpop.xlane.xlu1 %424  ;;  %v901_v62 = vpack.c.bf16 %v872_v38, %v871_v56  ;;  %v849_v0 = vmul.f32 %v2576_v7, %v811_v23 }
  0xe6   : > { %v422_v39 = vpop.xlane.xlu0 %421  ;;  %v2073_v57 = vpop.eup %2072  ;;  %v798_v43 = vmul.f32 %v2071_v2, %v702_v41  ;;  %v888_v15 = vadd.f32 %v2583_v5, %v850_v48 }
  0xe7   : > { %1980 = vmatprep.mubr.msk.bf16.mxu0 %vm341_vm0, %v901_v62  ;;  %v887_v45 = vadd.f32 %v2583_v5, %v849_v0  ;;  %v797_v54 = vmul.f32 %v2073_v57, %v701_v42  ;;  %v655_v62 = vmul.f32 %v2684_v13, %v2684_v13 }
  0xe8   : > { %v836_v18 = vmul.f32 %v2576_v7, %v798_v43  ;;  %v2704_v43 = vmul.f32 0.020833334, %v425_v14 }
  0xe9   : > { %v2075_v8 = vpop.eup %2074  ;;  %v532_v44 = vpop.xlane.xlu1 %531  ;;  %v909_v9 = vpack.c.bf16 %v888_v15, %v887_v45  ;;  %v835_v31 = vmul.f32 %v2576_v7, %v797_v54 }
  0xea   : > { %v529_v63 = vpop.xlane.xlu0 %528  ;;  %v2077_v1 = vpop.eup %2076  ;;  %v608_v22 = vmul.f32 0.020833334, %v532_v44  ;;  %v814_v52 = vmul.f32 %v2075_v8, %v718_v46  ;;  %v874_v59 = vadd.f32 %v2583_v5, %v836_v18 }
  0xeb   : > { %v607_v58 = vmul.f32 0.020833334, %v529_v63  ;;  %1996 = vmatprep.mubr.msk.bf16.mxu1 %vm341_vm0, %v909_v9  ;;  %v873_v26 = vadd.f32 %v2583_v5, %v835_v31  ;;  %v813_v27 = vmul.f32 %v2077_v1, %v717_v49  ;;  %v641_v49 = vmul.f32 %v2694_v55, %v2694_v55 }
  0xec   : > { %v672_v12 = vsub.f32 %v608_v22, %v640_v6  ;;  %v852_v37 = vmul.f32 %v2576_v7, %v814_v52  ;;  %v2708_v63 = vmul.f32 0.020833334, %v422_v39 }
  0xed   : > { %v671_v40 = vsub.f32 %v607_v58, %v639_v51  ;;  %v580_v21 = vpop.xlane.xlu1 %579  ;;  %v902_v38 = vpack.c.bf16 %v874_v59, %v873_v26  ;;  %v851_v23 = vmul.f32 %v2576_v7, %v813_v27  ;;  %v658_v51 = vmul.f32 %v2704_v43, %v2704_v43 }
  0xee   : > { %v577_v56 = vpop.xlane.xlu0 %576  ;;  %v736_v41 = vadd.f32 1e-05, %v672_v12  ;;  %v624_v42 = vmul.f32 0.020833334, %v580_v21  ;;  %v890_v50 = vadd.f32 %v2583_v5, %v852_v37  ;;  %v657_v26 = vmul.f32 %v2708_v63, %v2708_v63 }
  0xef   : > { %v735_v2 = vadd.f32 1e-05, %v671_v40  ;;  %v623_v0 = vmul.f32 0.020833334, %v577_v56  ;;  %1981 = vmatmul.mubr.msk.bf16.gmra.mxu0 %vm341_vm0, %v902_v38  ;;  %v889_v48 = vadd.f32 %v2583_v5, %v851_v23  ;;  %v704_v21 = vsub.f32 %v2409_v19, %v2661_v47 }
  0xf0   : > { %2078 = vrsqrt.f32 %v736_v41  ;;  %v688_v57 = vsub.f32 %v624_v42, %v656_v36  ;;  %v703_v38 = vsub.f32 %v2412_v20, %v2667_v53 }
  0xf1   : > { %2080 = vrsqrt.f32 %v735_v2  ;;  %v687_v45 = vsub.f32 %v623_v0, %v655_v62  ;;  %v538_v15 = vpop.xlane.xlu1 %537  ;;  %v910_v46 = vpack.c.bf16 %v890_v50, %v889_v48  ;;  %v720_v62 = vsub.f32 %v2420_v24, %v2678_v30 }
  0xf2   : > { %v535_v54 = vpop.xlane.xlu0 %534  ;;  %v752_v6 = vadd.f32 1e-05, %v688_v57  ;;  %v610_v8 = vmul.f32 0.020833334, %v538_v15  ;;  %v719_v48 = vsub.f32 %v2423_v25, %v2684_v13  ;;  %v706_v24 = vsub.f32 %v2430_v28, %v2689_v34 }
  0xf3   : > { %v609_v44 = vmul.f32 0.020833334, %v535_v54  ;;  %v751_v9 = vadd.f32 1e-05, %v687_v45  ;;  %1997 = vmatmul.mubr.msk.bf16.gmra.mxu1 %vm341_vm0, %v910_v46  ;;  %v705_v25 = vsub.f32 %v2433_v29, %v2694_v55  ;;  %v722_v29 = vsub.f32 %v2440_v32, %v2704_v43 }
  0xf4   : > { %2082 = vrsqrt.f32 %v752_v6  ;;  %v674_v31 = vsub.f32 %v610_v8, %v642_v35  ;;  %v721_v55 = vsub.f32 %v2443_v33, %v2708_v63 }
  0xf5   : > { %v673_v14 = vsub.f32 %v609_v44, %v641_v49  ;;  %2084 = vrsqrt.f32 %v751_v9  ;;  %v586_v18 = vpop.xlane.xlu1 %585 }
  0xf6   : > { %v583_v1 = vpop.xlane.xlu0 %582  ;;  %v738_v22 = vadd.f32 1e-05, %v674_v31  ;;  %v626_v52 = vmul.f32 0.020833334, %v586_v18 }
  0xf7   : > { %v737_v58 = vadd.f32 1e-05, %v673_v14  ;;  %v625_v39 = vmul.f32 0.020833334, %v583_v1 }
  0xf8   : > { %2086 = vrsqrt.f32 %v738_v22  ;;  %v690_v59 = vsub.f32 %v626_v52, %v658_v51 }
  0xf9   : > { %2088 = vrsqrt.f32 %v737_v58  ;;  %v689_v27 = vsub.f32 %v625_v39, %v657_v26  ;;  %v383_v12 = vpop.xlane.xlu1 %382 }
  0xfa   : > { %v380_v40 = vpop.xlane.xlu0 %379  ;;  %v754_v37 = vadd.f32 1e-05, %v690_v59  ;;  %v2729_v30 = vmul.f32 0.020833334, %v383_v12 }
  0xfb   : > { %v753_v36 = vadd.f32 1e-05, %v689_v27  ;;  %v2735_v31 = vmul.f32 0.020833334, %v380_v40 }
  0xfc   : > { %2090 = vrsqrt.f32 %v754_v37  ;;  %v644_v1 = vmul.f32 %v2729_v30, %v2729_v30 }
  0xfd   : > { %v2079_v56 = vpop.eup %2078  ;;  %2092 = vrsqrt.f32 %v753_v36  ;;  %v431_v23 = vpop.xlane.xlu1 %430  ;;  %v643_v32 = vmul.f32 %v2735_v31, %v2735_v31 }
  0xfe   : > { %v428_v41 = vpop.xlane.xlu0 %427  ;;  %v2081_v2 = vpop.eup %2080  ;;  %v800_v42 = vmul.f32 %v2079_v56, %v704_v21  ;;  %v2746_v22 = vmul.f32 0.020833334, %v431_v23 }
  0xff   : > { %v799_v50 = vmul.f32 %v2081_v2, %v703_v38  ;;  %v2752_v63 = vmul.f32 0.020833334, %v428_v41 }
 0x100   : > { %v838_v57 = vmul.f32 %v2576_v7, %v800_v42  ;;  %v660_v2 = vmul.f32 %v2746_v22, %v2746_v22 }
 0x101   : > { %v2083_v0 = vpop.eup %2082  ;;  %v389_v35 = vpop.xlane.xlu1 %388  ;;  %v837_v47 = vmul.f32 %v2576_v7, %v799_v50 }
 0x102   : > { %v386_v19 = vpop.xlane.xlu0 %385  ;;  %v2085_v20 = vpop.eup %2084  ;;  %v816_v53 = vmul.f32 %v2083_v0, %v720_v62  ;;  %v876_v15 = vadd.f32 %v2583_v5, %v838_v57  ;;  %v2757_v21 = vmul.f32 0.020833334, %v389_v35 }
 0x103   : > { %v875_v45 = vadd.f32 %v2583_v5, %v837_v47  ;;  %v815_v54 = vmul.f32 %v2085_v20, %v719_v48  ;;  %v2762_v42 = vmul.f32 0.020833334, %v386_v19  ;;  %v659_v20 = vmul.f32 %v2752_v63, %v2752_v63 }
 0x104   : > { %v854_v44 = vmul.f32 %v2576_v7, %v816_v53  ;;  %v646_v19 = vmul.f32 %v2757_v21, %v2757_v21 }
 0x105   : > { %v2087_v46 = vpop.eup %2086  ;;  %v437_v13 = vpop.xlane.xlu1 %436  ;;  %v903_v6 = vpack.c.bf16 %v876_v15, %v875_v45  ;;  %v853_v8 = vmul.f32 %v2576_v7, %v815_v54 }
 0x106   : > { %v434_v49 = vpop.xlane.xlu0 %433  ;;  %v2089_v9 = vpop.eup %2088  ;;  %v802_v14 = vmul.f32 %v2087_v46, %v706_v24  ;;  %v892_v34 = vadd.f32 %v2583_v5, %v854_v44  ;;  %v2772_v54 = vmul.f32 0.020833334, %v437_v13 }
 0x107   : > { %1984 = vmatprep.mubr.msk.bf16.mxu0 %vm341_vm0, %v903_v6  ;;  %v891_v28 = vadd.f32 %v2583_v5, %v853_v8  ;;  %v801_v18 = vmul.f32 %v2089_v9, %v705_v25  ;;  %v645_v8 = vmul.f32 %v2762_v42, %v2762_v42 }
 0x108   : > { %v840_v59 = vmul.f32 %v2576_v7, %v802_v14 }
 0x109   : > { %v2091_v51 = vpop.eup %2090  ;;  %v544_v58 = vpop.xlane.xlu1 %543  ;;  %v911_v26 = vpack.c.bf16 %v892_v34, %v891_v28  ;;  %v839_v39 = vmul.f32 %v2576_v7, %v801_v18  ;;  %v2776_v28 = vmul.f32 0.020833334, %v434_v49 }
 0x10a   : > { %v541_v52 = vpop.xlane.xlu0 %540  ;;  %v2093_v27 = vpop.eup %2092  ;;  %v612_v43 = vmul.f32 0.020833334, %v544_v58  ;;  %v818_v33 = vmul.f32 %v2091_v51, %v722_v29  ;;  %v878_v37 = vadd.f32 %v2583_v5, %v840_v59 }
 0x10b   : > { %v611_v12 = vmul.f32 0.020833334, %v541_v52  ;;  %2000 = vmatprep.mubr.msk.bf16.mxu1 %vm341_vm0, %v911_v26  ;;  %v877_v40 = vadd.f32 %v2583_v5, %v839_v39  ;;  %v817_v36 = vmul.f32 %v2093_v27, %v721_v55  ;;  %v661_v26 = vmul.f32 %v2776_v28, %v2776_v28 }
 0x10c   : > { %v676_v56 = vsub.f32 %v612_v43, %v644_v1  ;;  %v856_v23 = vmul.f32 %v2576_v7, %v818_v33  ;;  %v662_v1 = vmul.f32 %v2772_v54, %v2772_v54  ;;  %v708_v43 = vsub.f32 %v2474_v60, %v2729_v30 }
 0x10d   : > { %v675_v38 = vsub.f32 %v611_v12, %v643_v32  ;;  %v592_v41 = vpop.xlane.xlu1 %591  ;;  %v904_v62 = vpack.c.bf16 %v878_v37, %v877_v40  ;;  %v855_v0 = vmul.f32 %v2576_v7, %v817_v36  ;;  %v707_v33 = vsub.f32 %v2477_v61, %v2735_v31 }
 0x10e   : > { %v589_v50 = vpop.xlane.xlu0 %588  ;;  %v740_v48 = vadd.f32 1e-05, %v676_v56  ;;  %v628_v57 = vmul.f32 0.020833334, %v592_v41  ;;  %v894_v35 = vadd.f32 %v2583_v5, %v856_v23  ;;  %v724_v56 = vsub.f32 %v2484_v3, %v2746_v22 }
 0x10f   : > { %v739_v47 = vadd.f32 1e-05, %v675_v38  ;;  %v627_v53 = vmul.f32 0.020833334, %v589_v50  ;;  %1985 = vmatmul.mubr.msk.bf16.gmra.mxu0 %vm341_vm0, %v904_v62  ;;  %v893_v45 = vadd.f32 %v2583_v5, %v855_v0  ;;  %v710_v62 = vsub.f32 %v2494_v10, %v2757_v21 }
 0x110   : > { %2094 = vrsqrt.f32 %v740_v48  ;;  %v692_v15 = vsub.f32 %v628_v57, %v660_v2  ;;  %v723_v2 = vsub.f32 %v2487_v4, %v2752_v63  ;;  %v709_v0 = vsub.f32 %v2497_v11, %v2762_v42 }
 0x111   : > { %2096 = vrsqrt.f32 %v739_v47  ;;  %v691_v24 = vsub.f32 %v627_v53, %v659_v20  ;;  %v550_v46 = vpop.xlane.xlu1 %549  ;;  %v912_v6 = vpack.c.bf16 %v894_v35, %v893_v45  ;;  %v726_v10 = vsub.f32 %v2504_v16, %v2772_v54 }
 0x112   : > { %v547_v25 = vpop.xlane.xlu0 %546  ;;  %v756_v44 = vadd.f32 1e-05, %v692_v15  ;;  %v614_v9 = vmul.f32 0.020833334, %v550_v46  ;;  %v725_v11 = vsub.f32 %v2507_v17, %v2776_v28 }
 0x113   : > { %v613_v14 = vmul.f32 0.020833334, %v547_v25  ;;  %v755_v34 = vadd.f32 1e-05, %v691_v24  ;;  %2001 = vmatmul.mubr.msk.bf16.gmra.mxu1 %vm341_vm0, %v912_v6 }
 0x114   : > { %2098 = vrsqrt.f32 %v756_v44  ;;  %v678_v18 = vsub.f32 %v614_v9, %v646_v19  ;;  %v2822_v9 = vld [vmem:[%s3527_s4] ss:$0 sm:$0xff] }
 0x115   : > { %v677_v13 = vsub.f32 %v613_v14, %v645_v8  ;;  %2100 = vrsqrt.f32 %v755_v34  ;;  %v598_v29 = vpop.xlane.xlu1 %597 }
 0x116   : > { %v595_v55 = vpop.xlane.xlu0 %594  ;;  %v742_v51 = vadd.f32 1e-05, %v678_v18  ;;  %v630_v52 = vmul.f32 0.020833334, %v598_v29 }
 0x117   : > { %v741_v58 = vadd.f32 1e-05, %v677_v13  ;;  %v629_v49 = vmul.f32 0.020833334, %v595_v55 }
 0x118   : > { %2102 = vrsqrt.f32 %v742_v51  ;;  %v694_v39 = vsub.f32 %v630_v52, %v662_v1 }
 0x119   : > { %2104 = vrsqrt.f32 %v741_v58  ;;  %v693_v59 = vsub.f32 %v629_v49, %v661_v26 }
 0x11a   : > { %v758_v27 = vadd.f32 1e-05, %v694_v39 }
 0x11b   : > { %v757_v32 = vadd.f32 1e-05, %v693_v59 }
 0x11c   : > { %2106 = vrsqrt.f32 %v758_v27 }
 0x11d   : > { %v2095_v12 = vpop.eup %2094  ;;  %2108 = vrsqrt.f32 %v757_v32 }
 0x11e   : > { %v2097_v40 = vpop.eup %2096  ;;  %v804_v37 = vmul.f32 %v2095_v12, %v708_v43 }
 0x11f   : > { %v803_v36 = vmul.f32 %v2097_v40, %v707_v33 }
 0x120   : > { %v842_v38 = vmul.f32 %v2576_v7, %v804_v37 }
 0x121   : > { %v2099_v23 = vpop.eup %2098  ;;  %v841_v60 = vmul.f32 %v2576_v7, %v803_v36 }
 0x122   : > { %v2101_v30 = vpop.eup %2100  ;;  %v880_v41 = vadd.f32 %v2583_v5, %v842_v38  ;;  %v820_v50 = vmul.f32 %v2099_v23, %v724_v56 }
 0x123   : > { %v879_v61 = vadd.f32 %v2583_v5, %v841_v60  ;;  %v819_v31 = vmul.f32 %v2101_v30, %v723_v2 }
 0x124   : > { %v858_v3 = vmul.f32 %v2576_v7, %v820_v50 }
 0x125   : > { %v2103_v22 = vpop.eup %2102  ;;  %v905_v48 = vpack.c.bf16 %v880_v41, %v879_v61  ;;  %v857_v4 = vmul.f32 %v2576_v7, %v819_v31 }
 0x126   : > { %v2105_v63 = vpop.eup %2104  ;;  %v896_v47 = vadd.f32 %v2583_v5, %v858_v3  ;;  %v806_v57 = vmul.f32 %v2103_v22, %v710_v62 }
 0x127   : > { %1988 = vmatprep.mubr.msk.bf16.mxu0 %vm341_vm0, %v905_v48  ;;  %v895_v35 = vadd.f32 %v2583_v5, %v857_v4  ;;  %v805_v20 = vmul.f32 %v2105_v63, %v709_v0 }
 0x128   : > { %v844_v21 = vmul.f32 %v2576_v7, %v806_v57 }
 0x129   : > { %v2107_v53 = vpop.eup %2106  ;;  %v913_v42 = vpack.c.bf16 %v896_v47, %v895_v35  ;;  %v843_v45 = vmul.f32 %v2576_v7, %v805_v20 }
 0x12a   : > { %v2109_v19 = vpop.eup %2108  ;;  %v882_v15 = vadd.f32 %v2583_v5, %v844_v21  ;;  %v822_v24 = vmul.f32 %v2107_v53, %v726_v10 }
 0x12b   : > { %2004 = vmatprep.mubr.msk.bf16.mxu1 %vm341_vm0, %v913_v42  ;;  %v881_v46 = vadd.f32 %v2583_v5, %v843_v45  ;;  %v821_v25 = vmul.f32 %v2109_v19, %v725_v11 }
 0x12c   : > { %v860_v16 = vmul.f32 %v2576_v7, %v822_v24 }
 0x12d   : > { %v906_v54 = vpack.c.bf16 %v882_v15, %v881_v46  ;;  %v859_v6 = vmul.f32 %v2576_v7, %v821_v25 }
 0x12e   : > { %v898_v8 = vadd.f32 %v2583_v5, %v860_v16 }
 0x12f   : > { %1989 = vmatmul.mubr.msk.bf16.gmra.mxu0 %vm341_vm0, %v906_v54  ;;  %v897_v17 = vadd.f32 %v2583_v5, %v859_v6 }
 0x131   : > { %v914_v44 = vpack.c.bf16 %v898_v8, %v897_v17 }
 0x133   : > { %2005 = vmatmul.mubr.msk.bf16.gmra.mxu1 %vm341_vm0, %v914_v44 }
 0x18f   : > { %v1978_v14 = vpop.f32.mrf.mxu0 }
 0x190   : > { %v2825_v28 = vadd.f32 %v1978_v14, %v2822_v9 }
 0x191   : > { %v1064_v7 = vpop.f32.mrf.mxu0 }
 0x192   : > { %v1200_v34 = vsel %vm1193_vm1, %v2825_v28, 0.0  ;;  %v2836_v1 = vadd.f32 %v2822_v9, %v1064_v7  ;;  %v1325_v37 = vmul.f32 %v2825_v28, %v2825_v28 }
 0x193   : > { %1201 = vadd.xlane.f32.xlu0 %v1200_v34  ;;  %v1979_v18 = vpop.f32.mrf.mxu0  ;;  %v1994_v5 = vpop.f32.mrf.mxu1 }
 0x194   : > { %v2830_v13 = vadd.f32 %v1979_v18, %v2822_v9  ;;  %v2833_v29 = vadd.f32 %v1994_v5, %v2822_v9  ;;  %v1194_v27 = vsel %vm1193_vm1, %v2836_v1, 0.0  ;;  %v1361_v56 = vsel %vm1193_vm1, %v1325_v37, 0.0 }
 0x195   : > { %v1128_v55 = vpop.f32.mrf.mxu1  ;;  %v1067_v52 = vpop.f32.mrf.mxu0  ;;  %v1323_v41 = vmul.f32 %v2836_v1, %v2836_v1 }
 0x196   : > { %v1203_v51 = vsel %vm1193_vm1, %v2830_v13, 0.0  ;;  %v1248_v58 = vsel %vm1193_vm1, %v2833_v29, 0.0  ;;  %v2846_v39 = vadd.f32 %v2822_v9, %v1067_v52  ;;  %v2849_v59 = vadd.f32 %v2822_v9, %v1128_v55 }
 0x197   : > { %1204 = vadd.xlane.f32.xlu1 %v1203_v51  ;;  %1249 = vadd.xlane.f32.xlu0 %v1248_v58  ;;  %v1995_v26 = vpop.f32.mrf.mxu1  ;;  %v1326_v38 = vmul.f32 %v2830_v13, %v2830_v13  ;;  %v1341_v23 = vmul.f32 %v2833_v29, %v2833_v29  ;;  %v1355_v61 = vsel %vm1193_vm1, %v1323_v41, 0.0 }
 0x198   : > { %v2843_v49 = vadd.f32 %v1995_v26, %v2822_v9  ;;  %v1197_v33 = vsel %vm1193_vm1, %v2846_v39, 0.0  ;;  %v1242_v40 = vsel %vm1193_vm1, %v2849_v59, 0.0  ;;  %v1324_v31 = vmul.f32 %v2846_v39, %v2846_v39 }
 0x199   : > { %v1131_v43 = vpop.f32.mrf.mxu1  ;;  %v1364_v2 = vsel %vm1193_vm1, %v1326_v38, 0.0  ;;  %v1409_v60 = vsel %vm1193_vm1, %v1341_v23, 0.0  ;;  %v1339_v62 = vmul.f32 %v2849_v59, %v2849_v59 }
 0x19a   : > { %v1251_v32 = vsel %vm1193_vm1, %v2843_v49, 0.0  ;;  %v2856_v12 = vadd.f32 %v2822_v9, %v1131_v43  ;;  %v1342_v30 = vmul.f32 %v2843_v49, %v2843_v49  ;;  %v1358_v3 = vsel %vm1193_vm1, %v1324_v31, 0.0 }
 0x19b   : > { %1195 = vadd.xlane.f32.xlu0 %v1194_v27  ;;  %1252 = vadd.xlane.f32.xlu1 %v1251_v32  ;;  %v1403_v22 = vsel %vm1193_vm1, %v1339_v62, 0.0 }
 0x19c   : > { %v1245_v36 = vsel %vm1193_vm1, %v2856_v12, 0.0  ;;  %v1412_v50 = vsel %vm1193_vm1, %v1342_v30, 0.0  ;;  %v1340_v0 = vmul.f32 %v2856_v12, %v2856_v12 }
 0x19e   : > { %v1406_v47 = vsel %vm1193_vm1, %v1340_v0, 0.0 }
 0x19f   : > { %1198 = vadd.xlane.f32.xlu1 %v1197_v33  ;;  %1243 = vadd.xlane.f32.xlu0 %v1242_v40 }
 0x1a3   : > { %1246 = vadd.xlane.f32.xlu1 %v1245_v36  ;;  %1362 = vadd.xlane.f32.xlu0 %v1361_v56 }
 0x1a7   : > { %1365 = vadd.xlane.f32.xlu1 %v1364_v2  ;;  %1410 = vadd.xlane.f32.xlu0 %v1409_v60 }
 0x1ab   : > { %1413 = vadd.xlane.f32.xlu1 %v1412_v50  ;;  %1356 = vadd.xlane.f32.xlu0 %v1355_v61 }
 0x1af   : > { %1359 = vadd.xlane.f32.xlu1 %v1358_v3  ;;  %1404 = vadd.xlane.f32.xlu0 %v1403_v22  ;;  %v1982_v48 = vpop.f32.mrf.mxu0 }
 0x1b0   : > { %v2888_v4 = vadd.f32 %v1982_v48, %v2822_v9 }
 0x1b1   : > { %v1080_v63 = vpop.f32.mrf.mxu0 }
 0x1b2   : > { %v1212_v57 = vsel %vm1193_vm1, %v2888_v4, 0.0  ;;  %v2900_v11 = vadd.f32 %v2822_v9, %v1080_v63  ;;  %v1329_v14 = vmul.f32 %v2888_v4, %v2888_v4 }
 0x1b3   : > { %1407 = vadd.xlane.f32.xlu1 %v1406_v47  ;;  %1213 = vadd.xlane.f32.xlu0 %v1212_v57  ;;  %v1983_v35 = vpop.f32.mrf.mxu0  ;;  %v1998_v20 = vpop.f32.mrf.mxu1 }
 0x1b4   : > { %v2894_v10 = vadd.f32 %v1983_v35, %v2822_v9  ;;  %v2897_v21 = vadd.f32 %v1998_v20, %v2822_v9  ;;  %v1206_v16 = vsel %vm1193_vm1, %v2900_v11, 0.0  ;;  %v1373_v34 = vsel %vm1193_vm1, %v1329_v14, 0.0 }
 0x1b5   : > { %v1144_v53 = vpop.f32.mrf.mxu1  ;;  %v1083_v19 = vpop.f32.mrf.mxu0  ;;  %v1327_v52 = vmul.f32 %v2900_v11, %v2900_v11 }
 0x1b6   : > { %v1215_v42 = vsel %vm1193_vm1, %v2894_v10, 0.0  ;;  %v1260_v45 = vsel %vm1193_vm1, %v2897_v21, 0.0  ;;  %v2910_v46 = vadd.f32 %v2822_v9, %v1083_v19  ;;  %v2913_v25 = vadd.f32 %v2822_v9, %v1144_v53 }
 0x1b7   : > { %1216 = vadd.xlane.f32.xlu1 %v1215_v42  ;;  %1261 = vadd.xlane.f32.xlu0 %v1260_v45  ;;  %v1999_v15 = vpop.f32.mrf.mxu1  ;;  %v1330_v18 = vmul.f32 %v2894_v10, %v2894_v10  ;;  %v1345_v5 = vmul.f32 %v2897_v21, %v2897_v21  ;;  %v1367_v27 = vsel %vm1193_vm1, %v1327_v52, 0.0 }
 0x1b8   : > { %v2907_v24 = vadd.f32 %v1999_v15, %v2822_v9  ;;  %v1209_v17 = vsel %vm1193_vm1, %v2910_v46, 0.0  ;;  %v1254_v44 = vsel %vm1193_vm1, %v2913_v25, 0.0  ;;  %v1328_v32 = vmul.f32 %v2910_v46, %v2910_v46 }
 0x1b9   : > { %v1147_v6 = vpop.f32.mrf.mxu1  ;;  %v1376_v55 = vsel %vm1193_vm1, %v1330_v18, 0.0  ;;  %v1421_v51 = vsel %vm1193_vm1, %v1345_v5, 0.0  ;;  %v1343_v43 = vmul.f32 %v2913_v25, %v2913_v25 }
 0x1ba   : > { %v1263_v54 = vsel %vm1193_vm1, %v2907_v24, 0.0  ;;  %v2920_v8 = vadd.f32 %v2822_v9, %v1147_v6  ;;  %v1346_v58 = vmul.f32 %v2907_v24, %v2907_v24  ;;  %v1370_v33 = vsel %vm1193_vm1, %v1328_v32, 0.0 }
 0x1bb   : > { %1207 = vadd.xlane.f32.xlu0 %v1206_v16  ;;  %1264 = vadd.xlane.f32.xlu1 %v1263_v54  ;;  %v1415_v40 = vsel %vm1193_vm1, %v1343_v43, 0.0 }
 0x1bc   : > { %v1257_v7 = vsel %vm1193_vm1, %v2920_v8, 0.0  ;;  %v1424_v26 = vsel %vm1193_vm1, %v1346_v58, 0.0  ;;  %v1344_v37 = vmul.f32 %v2920_v8, %v2920_v8 }
 0x1be   : > { %v1418_v23 = vsel %vm1193_vm1, %v1344_v37, 0.0 }
 0x1bf   : > { %1210 = vadd.xlane.f32.xlu1 %v1209_v17  ;;  %1255 = vadd.xlane.f32.xlu0 %v1254_v44 }
 0x1c3   : > { %1258 = vadd.xlane.f32.xlu1 %v1257_v7  ;;  %1374 = vadd.xlane.f32.xlu0 %v1373_v34 }
 0x1c7   : > { %1377 = vadd.xlane.f32.xlu1 %v1376_v55  ;;  %1422 = vadd.xlane.f32.xlu0 %v1421_v51 }
 0x1cb   : > { %1425 = vadd.xlane.f32.xlu1 %v1424_v26  ;;  %1368 = vadd.xlane.f32.xlu0 %v1367_v27 }
 0x1cf   : > { %1371 = vadd.xlane.f32.xlu1 %v1370_v33  ;;  %1416 = vadd.xlane.f32.xlu0 %v1415_v40  ;;  %v1986_v36 = vpop.f32.mrf.mxu0 }
 0x1d0   : > { %v2952_v56 = vadd.f32 %v1986_v36, %v2822_v9 }
 0x1d1   : > { %v1096_v38 = vpop.f32.mrf.mxu0 }
 0x1d2   : > { %v1224_v2 = vsel %vm1193_vm1, %v2952_v56, 0.0  ;;  %v2964_v31 = vadd.f32 %v2822_v9, %v1096_v38  ;;  %v1333_v19 = vmul.f32 %v2952_v56, %v2952_v56 }
 0x1d3   : > { %1419 = vadd.xlane.f32.xlu1 %v1418_v23  ;;  %1225 = vadd.xlane.f32.xlu0 %v1224_v2  ;;  %v1987_v60 = vpop.f32.mrf.mxu0  ;;  %v2002_v30 = vpop.f32.mrf.mxu1 }
 0x1d4   : > { %v2958_v41 = vadd.f32 %v1987_v60, %v2822_v9  ;;  %v2961_v50 = vadd.f32 %v2002_v30, %v2822_v9  ;;  %v1218_v57 = vsel %vm1193_vm1, %v2964_v31, 0.0  ;;  %v1385_v16 = vsel %vm1193_vm1, %v1333_v19, 0.0 }
 0x1d5   : > { %v1160_v61 = vpop.f32.mrf.mxu1  ;;  %v1099_v22 = vpop.f32.mrf.mxu0  ;;  %v1331_v7 = vmul.f32 %v2964_v31, %v2964_v31 }
 0x1d6   : > { %v1227_v62 = vsel %vm1193_vm1, %v2958_v41, 0.0  ;;  %v1272_v3 = vsel %vm1193_vm1, %v2961_v50, 0.0  ;;  %v2974_v63 = vadd.f32 %v2822_v9, %v1099_v22  ;;  %v2977_v47 = vadd.f32 %v2822_v9, %v1160_v61 }
 0x1d7   : > { %1228 = vadd.xlane.f32.xlu1 %v1227_v62  ;;  %1273 = vadd.xlane.f32.xlu0 %v1272_v3  ;;  %v2003_v0 = vpop.f32.mrf.mxu1  ;;  %v1334_v54 = vmul.f32 %v2958_v41, %v2958_v41  ;;  %v1349_v6 = vmul.f32 %v2961_v50, %v2961_v50  ;;  %v1379_v18 = vsel %vm1193_vm1, %v1331_v7, 0.0 }
 0x1d8   : > { %v2971_v48 = vadd.f32 %v2003_v0, %v2822_v9  ;;  %v1221_v42 = vsel %vm1193_vm1, %v2974_v63, 0.0  ;;  %v1266_v45 = vsel %vm1193_vm1, %v2977_v47, 0.0  ;;  %v1332_v5 = vmul.f32 %v2974_v63, %v2974_v63 }
 0x1d9   : > { %v1163_v20 = vpop.f32.mrf.mxu1  ;;  %v1388_v17 = vsel %vm1193_vm1, %v1334_v54, 0.0  ;;  %v1433_v44 = vsel %vm1193_vm1, %v1349_v6, 0.0  ;;  %v1347_v55 = vmul.f32 %v2977_v47, %v2977_v47 }
 0x1da   : > { %v1275_v35 = vsel %vm1193_vm1, %v2971_v48, 0.0  ;;  %v2984_v53 = vadd.f32 %v2822_v9, %v1163_v20  ;;  %v1350_v14 = vmul.f32 %v2971_v48, %v2971_v48  ;;  %v1382_v51 = vsel %vm1193_vm1, %v1332_v5, 0.0 }
 0x1db   : > { %1219 = vadd.xlane.f32.xlu0 %v1218_v57  ;;  %1276 = vadd.xlane.f32.xlu1 %v1275_v35  ;;  %v1427_v58 = vsel %vm1193_vm1, %v1347_v55, 0.0 }
 0x1dc   : > { %v1269_v15 = vsel %vm1193_vm1, %v2984_v53, 0.0  ;;  %v1436_v34 = vsel %vm1193_vm1, %v1350_v14, 0.0  ;;  %v1348_v52 = vmul.f32 %v2984_v53, %v2984_v53 }
 0x1de   : > { %v1430_v43 = vsel %vm1193_vm1, %v1348_v52, 0.0 }
 0x1df   : > { %1222 = vadd.xlane.f32.xlu1 %v1221_v42  ;;  %1267 = vadd.xlane.f32.xlu0 %v1266_v45 }
 0x1e3   : > { %1270 = vadd.xlane.f32.xlu1 %v1269_v15  ;;  %1386 = vadd.xlane.f32.xlu0 %v1385_v16 }
 0x1e7   : > { %1389 = vadd.xlane.f32.xlu1 %v1388_v17  ;;  %1434 = vadd.xlane.f32.xlu0 %v1433_v44 }
 0x1eb   : > { %1437 = vadd.xlane.f32.xlu1 %v1436_v34  ;;  %1380 = vadd.xlane.f32.xlu0 %v1379_v18 }
 0x1ef   : > { %1383 = vadd.xlane.f32.xlu1 %v1382_v51  ;;  %1428 = vadd.xlane.f32.xlu0 %v1427_v58  ;;  %v1990_v26 = vpop.f32.mrf.mxu0 }
 0x1f0   : > { %v3016_v27 = vadd.f32 %v1990_v26, %v2822_v9 }
 0x1f1   : > { %v1112_v32 = vpop.f32.mrf.mxu0 }
 0x1f2   : > { %v1236_v33 = vsel %vm1193_vm1, %v3016_v27, 0.0  ;;  %v3028_v2 = vadd.f32 %v2822_v9, %v1112_v32  ;;  %v1337_v15 = vmul.f32 %v3016_v27, %v3016_v27 }
 0x1f3   : > { %1431 = vadd.xlane.f32.xlu1 %v1430_v43  ;;  %1237 = vadd.xlane.f32.xlu0 %v1236_v33  ;;  %v1991_v40 = vpop.f32.mrf.mxu0  ;;  %v2006_v37 = vpop.f32.mrf.mxu1 }
 0x1f4   : > { %v3022_v36 = vadd.f32 %v1991_v40, %v2822_v9  ;;  %v3025_v38 = vadd.f32 %v2006_v37, %v2822_v9  ;;  %v1230_v57 = vsel %vm1193_vm1, %v3028_v2, 0.0  ;;  %v1397_v54 = vsel %vm1193_vm1, %v1337_v15, 0.0 }
 0x1f5   : > { %v1176_v23 = vpop.f32.mrf.mxu1  ;;  %v1115_v61 = vpop.f32.mrf.mxu0  ;;  %v1335_v6 = vmul.f32 %v3028_v2, %v3028_v2 }
 0x1f6   : > { %v1239_v60 = vsel %vm1193_vm1, %v3022_v36, 0.0  ;;  %v1284_v30 = vsel %vm1193_vm1, %v3025_v38, 0.0  ;;  %v3038_v22 = vadd.f32 %v2822_v9, %v1115_v61  ;;  %v3041_v0 = vadd.f32 %v2822_v9, %v1176_v23 }
 0x1f7   : > { %1240 = vadd.xlane.f32.xlu1 %v1239_v60  ;;  %1285 = vadd.xlane.f32.xlu0 %v1284_v30  ;;  %v2007_v62 = vpop.f32.mrf.mxu1  ;;  %v1391_v44 = vsel %vm1193_vm1, %v1335_v6, 0.0  ;;  %v1353_v55 = vmul.f32 %v3025_v38, %v3025_v38 }
 0x1f8   : > { %v3035_v3 = vadd.f32 %v2007_v62, %v2822_v9  ;;  %v1233_v45 = vsel %vm1193_vm1, %v3038_v22, 0.0  ;;  %v1278_v19 = vsel %vm1193_vm1, %v3041_v0, 0.0  ;;  %v1336_v14 = vmul.f32 %v3038_v22, %v3038_v22 }
 0x1f9   : > { %v1179_v20 = vpop.f32.mrf.mxu1  ;;  %v1351_v7 = vmul.f32 %v3041_v0, %v3041_v0  ;;  %v1445_v58 = vsel %vm1193_vm1, %v1353_v55, 0.0 }
 0x1fa   : > { %v1287_v35 = vsel %vm1193_vm1, %v3035_v3, 0.0  ;;  %v3048_v42 = vadd.f32 %v2822_v9, %v1179_v20  ;;  %v1338_v9 = vmul.f32 %v3022_v36, %v3022_v36  ;;  %v1394_v34 = vsel %vm1193_vm1, %v1336_v14, 0.0 }
 0x1fb   : > { %1231 = vadd.xlane.f32.xlu0 %v1230_v57  ;;  %1288 = vadd.xlane.f32.xlu1 %v1287_v35  ;;  %v1439_v18 = vsel %vm1193_vm1, %v1351_v7, 0.0  ;;  %v1354_v52 = vmul.f32 %v3035_v3, %v3035_v3 }
 0x1fc   : > { %v1281_v16 = vsel %vm1193_vm1, %v3048_v42, 0.0  ;;  %v1400_v17 = vsel %vm1193_vm1, %v1338_v9, 0.0  ;;  %v1352_v5 = vmul.f32 %v3048_v42, %v3048_v42 }
 0x1fd   : > { %v1448_v26 = vsel %vm1193_vm1, %v1354_v52, 0.0 }
 0x1fe   : > { %v1442_v51 = vsel %vm1193_vm1, %v1352_v5, 0.0 }
 0x1ff   : > { %1234 = vadd.xlane.f32.xlu1 %v1233_v45  ;;  %1279 = vadd.xlane.f32.xlu0 %v1278_v19 }
 0x203   : > { %1282 = vadd.xlane.f32.xlu1 %v1281_v16  ;;  %1398 = vadd.xlane.f32.xlu0 %v1397_v54 }
 0x207   : > { %1401 = vadd.xlane.f32.xlu1 %v1400_v17  ;;  %1392 = vadd.xlane.f32.xlu0 %v1391_v44 }
 0x20b   : > { %1395 = vadd.xlane.f32.xlu1 %v1394_v34  ;;  %1440 = vadd.xlane.f32.xlu0 %v1439_v18 }
 0x20f   : > { %1443 = vadd.xlane.f32.xlu1 %v1442_v51  ;;  %1446 = vadd.xlane.f32.xlu0 %v1445_v58 }
 0x213   : > { %1449 = vadd.xlane.f32.xlu1 %v1448_v26 }
 0x21c   : > { %v1202_v32 = vpop.xlane.xlu0 %1201 }
 0x21d   : > { %v1293_v30 = vmul.f32 0.010416667, %v1202_v32 }
 0x21f   : > { %v1485_v35 = vmul.f32 %v1293_v30, %v1293_v30 }
 0x220   : > { %v1205_v43 = vpop.xlane.xlu1 %1204  ;;  %v1250_v33 = vpop.xlane.xlu0 %1249 }
 0x221   : > { %v3080_v61 = vmul.f32 0.010416667, %v1205_v43  ;;  %v3082_v20 = vmul.f32 0.010416667, %v1250_v33 }
 0x223   : > { %v1486_v15 = vmul.f32 %v3080_v61, %v3080_v61  ;;  %v1501_v6 = vmul.f32 %v3082_v20, %v3082_v20 }
 0x224   : > { %v1253_v40 = vpop.xlane.xlu1 %1252  ;;  %v1196_v37 = vpop.xlane.xlu0 %1195 }
 0x225   : > { %v3086_v16 = vmul.f32 0.010416667, %v1253_v40  ;;  %v3090_v7 = vmul.f32 0.010416667, %v1196_v37 }
 0x227   : > { %v1502_v52 = vmul.f32 %v3086_v16, %v3086_v16  ;;  %v1483_v33 = vmul.f32 %v3090_v7, %v3090_v7 }
 0x228   : > { %v1199_v23 = vpop.xlane.xlu1 %1198  ;;  %v1244_v60 = vpop.xlane.xlu0 %1243 }
 0x229   : > { %v3092_v5 = vmul.f32 0.010416667, %v1199_v23  ;;  %v3094_v55 = vmul.f32 0.010416667, %v1244_v60 }
 0x22b   : > { %v1484_v23 = vmul.f32 %v3092_v5, %v3092_v5 }
 0x22c   : > { %v1247_v62 = vpop.xlane.xlu1 %1246  ;;  %v1363_v57 = vpop.xlane.xlu0 %1362 }
 0x22d   : > { %v1453_v45 = vmul.f32 0.010416667, %v1363_v57  ;;  %v3102_v57 = vmul.f32 0.010416667, %v1247_v62 }
 0x22f   : > { %v1517_v19 = vsub.f32 %v1453_v45, %v1485_v35  ;;  %v1500_v62 = vmul.f32 %v3102_v57, %v3102_v57 }
 0x230   : > { %v1366_v54 = vpop.xlane.xlu1 %1365  ;;  %v1411_v9 = vpop.xlane.xlu0 %1410 }
 0x231   : > { %v1581_v17 = vadd.f32 1e-05, %v1517_v19  ;;  %v1454_v44 = vmul.f32 0.010416667, %v1366_v54  ;;  %v1469_v14 = vmul.f32 0.010416667, %v1411_v9  ;;  %v1499_v19 = vmul.f32 %v3094_v55, %v3094_v55 }
 0x233   : > { %2110 = vrsqrt.f32 %v1581_v17  ;;  %v1518_v34 = vsub.f32 %v1454_v44, %v1486_v15  ;;  %v1533_v18 = vsub.f32 %v1469_v14, %v1501_v6 }
 0x234   : > { %v1414_v51 = vpop.xlane.xlu1 %1413  ;;  %v1357_v58 = vpop.xlane.xlu0 %1356 }
 0x235   : > { %v1582_v26 = vadd.f32 1e-05, %v1518_v34  ;;  %v1597_v32 = vadd.f32 1e-05, %v1533_v18  ;;  %v1470_v43 = vmul.f32 0.010416667, %v1414_v51 }
 0x236   : > { %v1451_v40 = vmul.f32 0.010416667, %v1357_v58 }
 0x237   : > { %2112 = vrsqrt.f32 %v1582_v26  ;;  %v1534_v37 = vsub.f32 %v1470_v43, %v1502_v52  ;;  %v1549_v52 = vsub.f32 %v2825_v28, %v1293_v30  ;;  %v3112_v43 = vld [vmem:[%s3528_s5] ss:$0 sm:$0xff]  ;;  %v1550_v28 = vsub.f32 %v2830_v13, %v3080_v61 }
 0x238   : > { %2114 = vrsqrt.f32 %v1597_v32  ;;  %v1515_v60 = vsub.f32 %v1451_v40, %v1483_v33  ;;  %v1360_v35 = vpop.xlane.xlu1 %1359  ;;  %v1405_v45 = vpop.xlane.xlu0 %1404 }
 0x239   : > { %v1598_v15 = vadd.f32 1e-05, %v1534_v37  ;;  %v1452_v54 = vmul.f32 0.010416667, %v1360_v35  ;;  %v1467_v9 = vmul.f32 0.010416667, %v1405_v45  ;;  %v1565_v45 = vsub.f32 %v2833_v29, %v3082_v20 }
 0x23a   : > { %v1579_v6 = vadd.f32 1e-05, %v1515_v60  ;;  %v3117_v60 = vld [vmem:[%s3529_s6] ss:$0 sm:$0xff]  ;;  %v1566_v29 = vsub.f32 %v2843_v49, %v3086_v16  ;;  %v1769_v16 = vld [vmem:[%s3530_s7 + $0x90] sm:$0xff] }
 0x23b   : > { %2116 = vrsqrt.f32 %v1598_v15  ;;  %v1516_v17 = vsub.f32 %v1452_v54, %v1484_v23  ;;  %v1531_v44 = vsub.f32 %v1467_v9, %v1499_v19  ;;  %v1753_v19 = vld [vmem:[%s3530_s7 + $0x10] sm:$0xff] }
 0x23c   : > { %2118 = vrsqrt.f32 %v1579_v6  ;;  %v1408_v14 = vpop.xlane.xlu1 %1407  ;;  %v1214_v34 = vpop.xlane.xlu0 %1213 }
 0x23d   : > { %v1580_v18 = vadd.f32 1e-05, %v1516_v17  ;;  %v1595_v51 = vadd.f32 1e-05, %v1531_v44  ;;  %v1468_v58 = vmul.f32 0.010416667, %v1408_v14  ;;  %v1547_v14 = vsub.f32 %v2836_v1, %v3090_v7 }
 0x23f   : > { %2120 = vrsqrt.f32 %v1580_v18  ;;  %v1532_v26 = vsub.f32 %v1468_v58, %v1500_v62  ;;  %v1754_v62 = vld [vmem:[%s3530_s7 + $0x18] sm:$0xff] }
 0x240   : > { %v2111_v32 = vpop.eup %2110  ;;  %2122 = vrsqrt.f32 %v1595_v51  ;;  %v1217_v33 = vpop.xlane.xlu1 %1216 }
 0x241   : > { %v1262_v40 = vpop.xlane.xlu0 %1261  ;;  %v1645_v37 = vmul.f32 %v2111_v32, %v1549_v52  ;;  %v1596_v23 = vadd.f32 1e-05, %v1532_v26  ;;  %v3153_v32 = vmul.f32 0.010416667, %v1214_v34 }
 0x243   : > { %v1683_v30 = vmul.f32 %v3112_v43, %v1645_v37  ;;  %2124 = vrsqrt.f32 %v1596_v23  ;;  %v1548_v37 = vsub.f32 %v2846_v39, %v3092_v5 }
 0x244   : > { %v2113_v35 = vpop.eup %2112  ;;  %v1265_v15 = vpop.xlane.xlu1 %1264 }
 0x245   : > { %v3127_v54 = vpop.xlane.xlu0 %1207  ;;  %v2115_v9 = vpop.eup %2114  ;;  %v1721_v6 = vadd.f32 %v3117_v60, %v1683_v30  ;;  %v1646_v17 = vmul.f32 %v2113_v35, %v1550_v28  ;;  %v3158_v30 = vmul.f32 0.010416667, %v1217_v33 }
 0x246   : > { %v1661_v13 = vmul.f32 %v2115_v9, %v1565_v45  ;;  %v1563_v45 = vsub.f32 %v2849_v59, %v3094_v55  ;;  %v1770_v9 = vld [vmem:[%s3530_s7 + $0x98] sm:$0xff]  ;;  %v1751_v59 = vld [vmem:[%s3530_s7] sm:$0xff] }
 0x247   : > { %v1785_v61 = vadd.f32 %v1753_v19, %v1721_v6  ;;  %v1684_v20 = vmul.f32 %v3112_v43, %v1646_v17  ;;  %v3166_v6 = vmul.f32 0.010416667, %v1262_v40 }
 0x248   : > { %v2117_v44 = vpop.eup %2116  ;;  %v1699_v18 = vmul.f32 %v3112_v43, %v1661_v13  ;;  %v1211_v51 = vpop.xlane.xlu1 %1210 }
 0x249   : > { %v1256_v58 = vpop.xlane.xlu0 %1255  ;;  %v2119_v52 = vpop.eup %2118  ;;  %1817 = vst.msk [vmem:[%s3135_s18 + $0x10] sm:$0xff] %vm1193_vm1, %v1785_v61  ;;  %v1722_v49 = vadd.f32 %v3117_v60, %v1684_v20  ;;  %v1662_v26 = vmul.f32 %v2117_v44, %v1566_v29  ;;  %v1489_v61 = vmul.f32 %v3153_v32, %v3153_v32  ;;  %v3179_v20 = vmul.f32 0.010416667, %v1265_v15 }
 0x24a   : > { %v1737_v1 = vadd.f32 %v3117_v60, %v1699_v18  ;;  %v1643_v7 = vmul.f32 %v2119_v52, %v1547_v14  ;;  %v1564_v44 = vsub.f32 %v2856_v12, %v3102_v57  ;;  %v1490_v18 = vmul.f32 %v3158_v30, %v3158_v30 }
 0x24b   : > { %v1786_v23 = vadd.f32 %v1754_v62, %v1722_v49  ;;  %v1700_v28 = vmul.f32 %v3112_v43, %v1662_v26  ;;  %v1505_v15 = vmul.f32 %v3166_v6, %v3166_v6 }
 0x24c   : > { %v2121_v35 = vpop.eup %2120  ;;  %v1801_v19 = vadd.f32 %v1769_v16, %v1737_v1  ;;  %v1681_v34 = vmul.f32 %v3112_v43, %v1643_v7  ;;  %v1259_v39 = vpop.xlane.xlu1 %1258  ;;  %v1752_v16 = vld [vmem:[%s3530_s7 + $0x8] sm:$0xff] }
 0x24d   : > { %v1375_v5 = vpop.xlane.xlu0 %1374  ;;  %v2123_v17 = vpop.eup %2122  ;;  %1818 = vst.msk [vmem:[%s3135_s18 + $0x18] sm:$0xff] %vm1193_vm1, %v1786_v23  ;;  %v1738_v33 = vadd.f32 %v3117_v60, %v1700_v28  ;;  %v1644_v55 = vmul.f32 %v2121_v35, %v1548_v37  ;;  %v1767_v37 = vld [vmem:[%s3530_s7 + $0x80] sm:$0xff] }
 0x24e   : > { %v1457_v13 = vmul.f32 0.010416667, %v1375_v5  ;;  %1833 = vst.msk [vmem:[%s3135_s18 + $0x90] sm:$0xff] %vm1193_vm1, %v1801_v19  ;;  %v1719_v29 = vadd.f32 %v3117_v60, %v1681_v34  ;;  %v1659_v40 = vmul.f32 %v2123_v17, %v1563_v45  ;;  %v1506_v19 = vmul.f32 %v3179_v20, %v3179_v20 }
 0x24f   : > { %v1802_v14 = vadd.f32 %v1770_v9, %v1738_v33  ;;  %v1682_v62 = vmul.f32 %v3112_v43, %v1644_v55  ;;  %v3204_v9 = vmul.f32 0.010416667, %v3127_v54 }
 0x250   : > { %v2125_v52 = vpop.eup %2124  ;;  %v1783_v49 = vadd.f32 %v1751_v59, %v1719_v29  ;;  %v1697_v26 = vmul.f32 %v3112_v43, %v1659_v40  ;;  %v1521_v1 = vsub.f32 %v1457_v13, %v1489_v61  ;;  %v1378_v12 = vpop.xlane.xlu1 %1377  ;;  %v1768_v13 = vld [vmem:[%s3530_s7 + $0x88] sm:$0xff]  ;;  %v3210_v29 = vmul.f32 0.010416667, %v1211_v51 }
 0x251   : > { %v1423_v57 = vpop.xlane.xlu0 %1422  ;;  %1834 = vst.msk [vmem:[%s3135_s18 + $0x98] sm:$0xff] %vm1193_vm1, %v1802_v14  ;;  %v1720_v7 = vadd.f32 %v3117_v60, %v1682_v62  ;;  %v1660_v23 = vmul.f32 %v2125_v52, %v1564_v44  ;;  %v1458_v28 = vmul.f32 0.010416667, %v1378_v12  ;;  %v3212_v40 = vmul.f32 0.010416667, %v1256_v58 }
 0x252   : > { %v1473_v35 = vmul.f32 0.010416667, %v1423_v57  ;;  %1815 = vst.msk [vmem:[%s3135_s18] sm:$0xff] %vm1193_vm1, %v1783_v49  ;;  %v1735_v45 = vadd.f32 %v3117_v60, %v1697_v26  ;;  %v1585_v34 = vadd.f32 1e-05, %v1521_v1  ;;  %v1487_v52 = vmul.f32 %v3204_v9, %v3204_v9 }
 0x253   : > { %v1784_v5 = vadd.f32 %v1752_v16, %v1720_v7  ;;  %v1698_v17 = vmul.f32 %v3112_v43, %v1660_v23  ;;  %v1522_v33 = vsub.f32 %v1458_v28, %v1490_v18  ;;  %v1488_v16 = vmul.f32 %v3210_v29, %v3210_v29 }
 0x254   : > { %v1537_v59 = vsub.f32 %v1473_v35, %v1505_v15  ;;  %v1799_v55 = vadd.f32 %v1767_v37, %v1735_v45  ;;  %2126 = vrsqrt.f32 %v1585_v34  ;;  %v1426_v61 = vpop.xlane.xlu1 %1425  ;;  %v3223_v26 = vmul.f32 0.010416667, %v1259_v39 }
 0x255   : > { %v1369_v54 = vpop.xlane.xlu0 %1368  ;;  %1816 = vst.msk [vmem:[%s3135_s18 + $0x8] sm:$0xff] %vm1193_vm1, %v1784_v5  ;;  %v1736_v44 = vadd.f32 %v3117_v60, %v1698_v17  ;;  %v1586_v14 = vadd.f32 1e-05, %v1522_v33  ;;  %v1474_v18 = vmul.f32 0.010416667, %v1426_v61  ;;  %v1503_v57 = vmul.f32 %v3212_v40, %v3212_v40 }
 0x256   : > { %v1601_v62 = vadd.f32 1e-05, %v1537_v59  ;;  %1831 = vst.msk [vmem:[%s3135_s18 + $0x80] sm:$0xff] %vm1193_vm1, %v1799_v55  ;;  %v1455_v51 = vmul.f32 0.010416667, %v1369_v54  ;;  %v1504_v34 = vmul.f32 %v3223_v26, %v3223_v26  ;;  %v1553_v55 = vsub.f32 %v2888_v4, %v3153_v32  ;;  %v1757_v32 = vld [vmem:[%s3530_s7 + $0x30] sm:$0xff] }
 0x257   : > { %v1800_v49 = vadd.f32 %v1768_v13, %v1736_v44  ;;  %2128 = vrsqrt.f32 %v1586_v14  ;;  %v1538_v58 = vsub.f32 %v1474_v18, %v1506_v19 }
 0x258   : > { %2130 = vrsqrt.f32 %v1601_v62  ;;  %v1519_v15 = vsub.f32 %v1455_v51, %v1487_v52  ;;  %v1372_v1 = vpop.xlane.xlu1 %1371  ;;  %v1554_v62 = vsub.f32 %v2894_v10, %v3158_v30  ;;  %v1569_v52 = vsub.f32 %v2897_v21, %v3166_v6 }
 0x259   : > { %v1417_v12 = vpop.xlane.xlu0 %1416  ;;  %1832 = vst.msk [vmem:[%s3135_s18 + $0x88] sm:$0xff] %vm1193_vm1, %v1800_v49  ;;  %v1602_v7 = vadd.f32 1e-05, %v1538_v58  ;;  %v1456_v37 = vmul.f32 0.010416667, %v1372_v1  ;;  %v1570_v30 = vsub.f32 %v2907_v24, %v3179_v20  ;;  %v1551_v1 = vsub.f32 %v2900_v11, %v3204_v9  ;;  %v1773_v24 = vld [vmem:[%s3530_s7 + $0xb0] sm:$0xff] }
 0x25a   : > { %v1471_v23 = vmul.f32 0.010416667, %v1417_v12  ;;  %v1583_v28 = vadd.f32 1e-05, %v1519_v15 }
 0x25b   : > { %2132 = vrsqrt.f32 %v1602_v7  ;;  %v1520_v35 = vsub.f32 %v1456_v37, %v1488_v16 }
 0x25c   : > { %v1535_v45 = vsub.f32 %v1471_v23, %v1503_v57  ;;  %2134 = vrsqrt.f32 %v1583_v28  ;;  %v1420_v19 = vpop.xlane.xlu1 %1419  ;;  %v1758_v57 = vld [vmem:[%s3530_s7 + $0x38] sm:$0xff] }
 0x25d   : > { %v1226_v39 = vpop.xlane.xlu0 %1225  ;;  %v1584_v5 = vadd.f32 1e-05, %v1520_v35  ;;  %v1472_v33 = vmul.f32 0.010416667, %v1420_v19  ;;  %v1552_v19 = vsub.f32 %v2910_v46, %v3210_v29 }
 0x25e   : > { %v1599_v17 = vadd.f32 1e-05, %v1535_v45  ;;  %v3260_v45 = vmul.f32 0.010416667, %v1226_v39 }
 0x25f   : > { %2136 = vrsqrt.f32 %v1584_v5  ;;  %v1536_v59 = vsub.f32 %v1472_v33, %v1504_v34 }
 0x260   : > { %2138 = vrsqrt.f32 %v1599_v17  ;;  %v1229_v13 = vpop.xlane.xlu1 %1228 }
 0x261   : > { %v1274_v61 = vpop.xlane.xlu0 %1273  ;;  %v2127_v54 = vpop.eup %2126  ;;  %v1600_v44 = vadd.f32 1e-05, %v1536_v59  ;;  %v3265_v17 = vmul.f32 0.010416667, %v1229_v13  ;;  %v1567_v59 = vsub.f32 %v2913_v25, %v3212_v40  ;;  %v1755_v25 = vld [vmem:[%s3530_s7 + $0x20] sm:$0xff] }
 0x262   : > { %v1649_v14 = vmul.f32 %v2127_v54, %v1553_v55  ;;  %v1774_v54 = vld [vmem:[%s3530_s7 + $0xb8] sm:$0xff] }
 0x263   : > { %2140 = vrsqrt.f32 %v1600_v44  ;;  %v3273_v44 = vmul.f32 0.010416667, %v1274_v61 }
 0x264   : > { %v2129_v18 = vpop.eup %2128  ;;  %v1687_v51 = vmul.f32 %v3112_v43, %v1649_v14  ;;  %v1277_v49 = vpop.xlane.xlu1 %1276 }
 0x265   : > { %v3238_v58 = vpop.xlane.xlu0 %1219  ;;  %v2131_v4 = vpop.eup %2130  ;;  %v1650_v16 = vmul.f32 %v2129_v18, %v1554_v62 }
 0x266   : > { %v1725_v15 = vadd.f32 %v3117_v60, %v1687_v51  ;;  %v1665_v10 = vmul.f32 %v2131_v4, %v1569_v52  ;;  %v1493_v52 = vmul.f32 %v3260_v45, %v3260_v45  ;;  %v3286_v51 = vmul.f32 0.010416667, %v1277_v49 }
 0x267   : > { %v1688_v21 = vmul.f32 %v3112_v43, %v1650_v16  ;;  %v1568_v4 = vsub.f32 %v2920_v8, %v3223_v26  ;;  %v1509_v49 = vmul.f32 %v3273_v44, %v3273_v44 }
 0x268   : > { %v2133_v6 = vpop.eup %2132  ;;  %v1789_v12 = vadd.f32 %v1757_v32, %v1725_v15  ;;  %v1703_v7 = vmul.f32 %v3112_v43, %v1665_v10  ;;  %v1223_v37 = vpop.xlane.xlu1 %1222  ;;  %v1494_v15 = vmul.f32 %v3265_v17, %v3265_v17 }
 0x269   : > { %v1268_v23 = vpop.xlane.xlu0 %1267  ;;  %v2135_v28 = vpop.eup %2134  ;;  %v1726_v35 = vadd.f32 %v3117_v60, %v1688_v21  ;;  %v1666_v20 = vmul.f32 %v2133_v6, %v1570_v30  ;;  %v1756_v21 = vld [vmem:[%s3530_s7 + $0x28] sm:$0xff] }
 0x26a   : > { %1821 = vst.msk [vmem:[%s3135_s18 + $0x30] sm:$0xff] %vm1193_vm1, %v1789_v12  ;;  %v1741_v11 = vadd.f32 %v3117_v60, %v1703_v7  ;;  %v1647_v9 = vmul.f32 %v2135_v28, %v1551_v1 }
 0x26b   : > { %v1790_v34 = vadd.f32 %v1758_v57, %v1726_v35  ;;  %v1704_v5 = vmul.f32 %v3112_v43, %v1666_v20  ;;  %v1771_v57 = vld [vmem:[%s3530_s7 + $0xa0] sm:$0xff]  ;;  %v1510_v20 = vmul.f32 %v3286_v51, %v3286_v51 }
 0x26c   : > { %v2137_v33 = vpop.eup %2136  ;;  %v1805_v55 = vadd.f32 %v1773_v24, %v1741_v11  ;;  %v1685_v39 = vmul.f32 %v3112_v43, %v1647_v9  ;;  %v1271_v46 = vpop.xlane.xlu1 %1270  ;;  %v3311_v11 = vmul.f32 0.010416667, %v3238_v58 }
 0x26d   : > { %v1387_v29 = vpop.xlane.xlu0 %1386  ;;  %v2139_v14 = vpop.eup %2138  ;;  %1822 = vst.msk [vmem:[%s3135_s18 + $0x38] sm:$0xff] %vm1193_vm1, %v1790_v34  ;;  %v1742_v13 = vadd.f32 %v3117_v60, %v1704_v5  ;;  %v1648_v40 = vmul.f32 %v2137_v33, %v1552_v19 }
 0x26e   : > { %v1461_v62 = vmul.f32 0.010416667, %v1387_v29  ;;  %1837 = vst.msk [vmem:[%s3135_s18 + $0xb0] sm:$0xff] %vm1193_vm1, %v1805_v55  ;;  %v1723_v18 = vadd.f32 %v3117_v60, %v1685_v39  ;;  %v1663_v61 = vmul.f32 %v2139_v14, %v1567_v59  ;;  %v1772_v55 = vld [vmem:[%s3530_s7 + $0xa8] sm:$0xff]  ;;  %v3319_v39 = vmul.f32 0.010416667, %v1268_v23 }
 0x26f   : > { %v1806_v32 = vadd.f32 %v1774_v54, %v1742_v13  ;;  %v1686_v16 = vmul.f32 %v3112_v43, %v1648_v40  ;;  %v3317_v54 = vmul.f32 0.010416667, %v1223_v37 }
 0x270   : > { %v2141_v10 = vpop.eup %2140  ;;  %v1787_v30 = vadd.f32 %v1755_v25, %v1723_v18  ;;  %v1701_v6 = vmul.f32 %v3112_v43, %v1663_v61  ;;  %v1525_v1 = vsub.f32 %v1461_v62, %v1493_v52  ;;  %v1390_v8 = vpop.xlane.xlu1 %1389  ;;  %v1491_v62 = vmul.f32 %v3311_v11, %v3311_v11 }
 0x271   : > { %v1435_v26 = vpop.xlane.xlu0 %1434  ;;  %1838 = vst.msk [vmem:[%s3135_s18 + $0xb8] sm:$0xff] %vm1193_vm1, %v1806_v32  ;;  %v1724_v12 = vadd.f32 %v3117_v60, %v1686_v16  ;;  %v1664_v7 = vmul.f32 %v2141_v10, %v1568_v4  ;;  %v1462_v28 = vmul.f32 0.010416667, %v1390_v8  ;;  %v1492_v61 = vmul.f32 %v3317_v54, %v3317_v54 }
 0x272   : > { %v1477_v35 = vmul.f32 0.010416667, %v1435_v26  ;;  %1819 = vst.msk [vmem:[%s3135_s18 + $0x20] sm:$0xff] %vm1193_vm1, %v1787_v30  ;;  %v1739_v24 = vadd.f32 %v3117_v60, %v1701_v6  ;;  %v1589_v9 = vadd.f32 1e-05, %v1525_v1 }
 0x273   : > { %v1788_v19 = vadd.f32 %v1756_v21, %v1724_v12  ;;  %v1702_v34 = vmul.f32 %v3112_v43, %v1664_v7  ;;  %v1526_v5 = vsub.f32 %v1462_v28, %v1494_v15  ;;  %v3330_v52 = vmul.f32 0.010416667, %v1271_v46 }
 0x274   : > { %v1541_v33 = vsub.f32 %v1477_v35, %v1509_v49  ;;  %v1803_v59 = vadd.f32 %v1771_v57, %v1739_v24  ;;  %2142 = vrsqrt.f32 %v1589_v9  ;;  %v1438_v29 = vpop.xlane.xlu1 %1437  ;;  %v1507_v15 = vmul.f32 %v3319_v39, %v3319_v39 }
 0x275   : > { %v1381_v58 = vpop.xlane.xlu0 %1380  ;;  %1820 = vst.msk [vmem:[%s3135_s18 + $0x28] sm:$0xff] %vm1193_vm1, %v1788_v19  ;;  %v1740_v14 = vadd.f32 %v3117_v60, %v1702_v34  ;;  %v1590_v13 = vadd.f32 1e-05, %v1526_v5  ;;  %v1478_v40 = vmul.f32 0.010416667, %v1438_v29  ;;  %v1508_v26 = vmul.f32 %v3330_v52, %v3330_v52 }
 0x276   : > { %v1605_v25 = vadd.f32 1e-05, %v1541_v33  ;;  %1835 = vst.msk [vmem:[%s3135_s18 + $0xa0] sm:$0xff] %vm1193_vm1, %v1803_v59  ;;  %v1459_v37 = vmul.f32 0.010416667, %v1381_v58  ;;  %v1557_v35 = vsub.f32 %v2952_v56, %v3260_v45  ;;  %v1558_v5 = vsub.f32 %v2958_v41, %v3265_v17  ;;  %v1761_v58 = vld [vmem:[%s3530_s7 + $0x50] sm:$0xff] }
 0x277   : > { %v1804_v18 = vadd.f32 %v1772_v55, %v1740_v14  ;;  %2144 = vrsqrt.f32 %v1590_v13  ;;  %v1542_v23 = vsub.f32 %v1478_v40, %v1510_v20  ;;  %v1573_v59 = vsub.f32 %v2961_v50, %v3273_v44 }
 0x278   : > { %2146 = vrsqrt.f32 %v1605_v25  ;;  %v1523_v4 = vsub.f32 %v1459_v37, %v1491_v62  ;;  %v1384_v32 = vpop.xlane.xlu1 %1383  ;;  %v1574_v17 = vsub.f32 %v2971_v48, %v3286_v51  ;;  %v1555_v25 = vsub.f32 %v2964_v31, %v3311_v11  ;;  %v1762_v62 = vld [vmem:[%s3530_s7 + $0x58] sm:$0xff]  ;;  %v1777_v48 = vld [vmem:[%s3530_s7 + $0xd0] sm:$0xff] }
 0x279   : > { %v1429_v16 = vpop.xlane.xlu0 %1428  ;;  %1836 = vst.msk [vmem:[%s3135_s18 + $0xa8] sm:$0xff] %vm1193_vm1, %v1804_v18  ;;  %v1606_v10 = vadd.f32 1e-05, %v1542_v23  ;;  %v1460_v30 = vmul.f32 0.010416667, %v1384_v32  ;;  %v1556_v31 = vsub.f32 %v2974_v63, %v3317_v54  ;;  %v1571_v63 = vsub.f32 %v2977_v47, %v3319_v39 }
 0x27a   : > { %v1475_v21 = vmul.f32 0.010416667, %v1429_v16  ;;  %v1587_v6 = vadd.f32 1e-05, %v1523_v4  ;;  %v1572_v39 = vsub.f32 %v2984_v53, %v3330_v52 }
 0x27b   : > { %2148 = vrsqrt.f32 %v1606_v10  ;;  %v1524_v49 = vsub.f32 %v1460_v30, %v1492_v61 }
 0x27c   : > { %v1539_v1 = vsub.f32 %v1475_v21, %v1507_v15  ;;  %2150 = vrsqrt.f32 %v1587_v6  ;;  %v1432_v8 = vpop.xlane.xlu1 %1431 }
 0x27d   : > { %v1238_v46 = vpop.xlane.xlu0 %1237  ;;  %v1588_v12 = vadd.f32 1e-05, %v1524_v49  ;;  %v1476_v7 = vmul.f32 0.010416667, %v1432_v8  ;;  %v1778_v49 = vld [vmem:[%s3530_s7 + $0xd8] sm:$0xff] }
 0x27e   : > { %v1603_v57 = vadd.f32 1e-05, %v1539_v1  ;;  %v3371_v16 = vmul.f32 0.010416667, %v1238_v46 }
 0x27f   : > { %2152 = vrsqrt.f32 %v1588_v12  ;;  %v1540_v28 = vsub.f32 %v1476_v7, %v1508_v26 }
 0x280   : > { %2154 = vrsqrt.f32 %v1603_v57  ;;  %v1241_v24 = vpop.xlane.xlu1 %1240  ;;  %v1759_v57 = vld [vmem:[%s3530_s7 + $0x40] sm:$0xff] }
 0x281   : > { %v3340_v20 = vpop.xlane.xlu0 %1285  ;;  %v2143_v9 = vpop.eup %2142  ;;  %v1604_v19 = vadd.f32 1e-05, %v1540_v28  ;;  %v3374_v30 = vmul.f32 0.010416667, %v1241_v24  ;;  %v1497_v24 = vmul.f32 %v3371_v16, %v3371_v16 }
 0x282   : > { %v1653_v34 = vmul.f32 %v2143_v9, %v1557_v35 }
 0x283   : > { %2156 = vrsqrt.f32 %v1604_v19 }
 0x284   : > { %v2145_v33 = vpop.eup %2144  ;;  %v1691_v55 = vmul.f32 %v3112_v43, %v1653_v34  ;;  %v3347_v29 = vpop.xlane.xlu1 %1288  ;;  %v1498_v34 = vmul.f32 %v3374_v30, %v3374_v30 }
 0x285   : > { %v1232_v56 = vpop.xlane.xlu0 %1231  ;;  %v2147_v45 = vpop.eup %2146  ;;  %v1654_v14 = vmul.f32 %v2145_v33, %v1558_v5  ;;  %v1760_v33 = vld [vmem:[%s3530_s7 + $0x48] sm:$0xff] }
 0x286   : > { %v1729_v13 = vadd.f32 %v3117_v60, %v1691_v55  ;;  %v1669_v41 = vmul.f32 %v2147_v45, %v1573_v59  ;;  %v3376_v21 = vmul.f32 0.010416667, %v1232_v56 }
 0x287   : > { %v1692_v50 = vmul.f32 %v3112_v43, %v1654_v14 }
 0x288   : > { %v2149_v44 = vpop.eup %2148  ;;  %v1793_v40 = vadd.f32 %v1761_v58, %v1729_v13  ;;  %v1707_v37 = vmul.f32 %v3112_v43, %v1669_v41  ;;  %v1235_v18 = vpop.xlane.xlu1 %1234  ;;  %v1495_v5 = vmul.f32 %v3376_v21, %v3376_v21  ;;  %v1775_v13 = vld [vmem:[%s3530_s7 + $0xc0] sm:$0xff] }
 0x289   : > { %v1280_v23 = vpop.xlane.xlu0 %1279  ;;  %v2151_v61 = vpop.eup %2150  ;;  %v1730_v4 = vadd.f32 %v3117_v60, %v1692_v50  ;;  %v1670_v51 = vmul.f32 %v2149_v44, %v1574_v17  ;;  %v3406_v55 = vmul.f32 0.010416667, %v1235_v18 }
 0x28a   : > { %1825 = vst.msk [vmem:[%s3135_s18 + $0x50] sm:$0xff] %vm1193_vm1, %v1793_v40  ;;  %v1745_v11 = vadd.f32 %v3117_v60, %v1707_v37  ;;  %v1651_v32 = vmul.f32 %v2151_v61, %v1555_v25  ;;  %v3418_v25 = vmul.f32 0.010416667, %v3340_v20  ;;  %v3420_v40 = vmul.f32 0.010416667, %v1280_v23 }
 0x28b   : > { %v1794_v15 = vadd.f32 %v1762_v62, %v1730_v4  ;;  %v1708_v10 = vmul.f32 %v3112_v43, %v1670_v51  ;;  %v1776_v51 = vld [vmem:[%s3530_s7 + $0xc8] sm:$0xff] }
 0x28c   : > { %v2153_v6 = vpop.eup %2152  ;;  %v1809_v54 = vadd.f32 %v1777_v48, %v1745_v11  ;;  %v1689_v1 = vmul.f32 %v3112_v43, %v1651_v32  ;;  %v1283_v8 = vpop.xlane.xlu1 %1282 }
 0x28d   : > { %v1399_v46 = vpop.xlane.xlu0 %1398  ;;  %v2155_v26 = vpop.eup %2154  ;;  %1826 = vst.msk [vmem:[%s3135_s18 + $0x58] sm:$0xff] %vm1193_vm1, %v1794_v15  ;;  %v1746_v12 = vadd.f32 %v3117_v60, %v1708_v10  ;;  %v1652_v7 = vmul.f32 %v2153_v6, %v1556_v31  ;;  %v1496_v31 = vmul.f32 %v3406_v55, %v3406_v55  ;;  %v3428_v11 = vmul.f32 0.010416667, %v1283_v8 }
 0x28e   : > { %v1465_v47 = vmul.f32 0.010416667, %v1399_v46  ;;  %1841 = vst.msk [vmem:[%s3135_s18 + $0xd0] sm:$0xff] %vm1193_vm1, %v1809_v54  ;;  %v1727_v28 = vadd.f32 %v3117_v60, %v1689_v1  ;;  %v1667_v35 = vmul.f32 %v2155_v26, %v1571_v63  ;;  %v1511_v63 = vmul.f32 %v3420_v40, %v3420_v40 }
 0x28f   : > { %v1810_v9 = vadd.f32 %v1778_v49, %v1746_v12  ;;  %v1690_v19 = vmul.f32 %v3112_v43, %v1652_v7  ;;  %v1513_v8 = vmul.f32 %v3418_v25, %v3418_v25  ;;  %v3440_v46 = vmul.f32 0.010416667, %v3347_v29 }
 0x290   : > { %v2157_v53 = vpop.eup %2156  ;;  %v1791_v52 = vadd.f32 %v1759_v57, %v1727_v28  ;;  %v1705_v59 = vmul.f32 %v3112_v43, %v1667_v35  ;;  %v1529_v56 = vsub.f32 %v1465_v47, %v1497_v24  ;;  %v1402_v45 = vpop.xlane.xlu1 %1401  ;;  %v1512_v7 = vmul.f32 %v3428_v11, %v3428_v11 }
 0x291   : > { %v1393_v58 = vpop.xlane.xlu0 %1392  ;;  %1842 = vst.msk [vmem:[%s3135_s18 + $0xd8] sm:$0xff] %vm1193_vm1, %v1810_v9  ;;  %v1728_v14 = vadd.f32 %v3117_v60, %v1690_v19  ;;  %v1668_v41 = vmul.f32 %v2157_v53, %v1572_v39  ;;  %v1466_v17 = vmul.f32 0.010416667, %v1402_v45  ;;  %v1514_v29 = vmul.f32 %v3440_v46, %v3440_v46 }
 0x292   : > { %v1463_v50 = vmul.f32 0.010416667, %v1393_v58  ;;  %1823 = vst.msk [vmem:[%s3135_s18 + $0x40] sm:$0xff] %vm1193_vm1, %v1791_v52  ;;  %v1743_v44 = vadd.f32 %v3117_v60, %v1705_v59  ;;  %v1593_v62 = vadd.f32 1e-05, %v1529_v56  ;;  %v1562_v58 = vsub.f32 %v3022_v36, %v3374_v30 }
 0x293   : > { %v1792_v37 = vadd.f32 %v1760_v33, %v1728_v14  ;;  %v1706_v18 = vmul.f32 %v3112_v43, %v1668_v41  ;;  %v1530_v61 = vsub.f32 %v1466_v17, %v1498_v34  ;;  %v1561_v33 = vsub.f32 %v3016_v27, %v3371_v16  ;;  %v1765_v27 = vld [vmem:[%s3530_s7 + $0x70] sm:$0xff] }
 0x294   : > { %v1527_v4 = vsub.f32 %v1463_v50, %v1495_v5  ;;  %v1807_v48 = vadd.f32 %v1775_v13, %v1743_v44  ;;  %2158 = vrsqrt.f32 %v1593_v62  ;;  %v1396_v20 = vpop.xlane.xlu1 %1395  ;;  %v1559_v13 = vsub.f32 %v3028_v2, %v3376_v21 }
 0x295   : > { %v1441_v23 = vpop.xlane.xlu0 %1440  ;;  %1824 = vst.msk [vmem:[%s3135_s18 + $0x48] sm:$0xff] %vm1193_vm1, %v1792_v37  ;;  %v1744_v32 = vadd.f32 %v3117_v60, %v1706_v18  ;;  %v1594_v15 = vadd.f32 1e-05, %v1530_v61  ;;  %v1464_v6 = vmul.f32 0.010416667, %v1396_v20  ;;  %v1560_v36 = vsub.f32 %v3038_v22, %v3406_v55  ;;  %v1766_v37 = vld [vmem:[%s3530_s7 + $0x78] sm:$0xff] }
 0x296   : > { %v1591_v10 = vadd.f32 1e-05, %v1527_v4  ;;  %1839 = vst.msk [vmem:[%s3135_s18 + $0xc0] sm:$0xff] %vm1193_vm1, %v1807_v48  ;;  %v1479_v54 = vmul.f32 0.010416667, %v1441_v23  ;;  %v1575_v2 = vsub.f32 %v3041_v0, %v3420_v40  ;;  %v1763_v22 = vld [vmem:[%s3530_s7 + $0x60] sm:$0xff]  ;;  %v1576_v48 = vsub.f32 %v3048_v42, %v3428_v11 }
 0x297   : > { %v1808_v49 = vadd.f32 %v1776_v51, %v1744_v32  ;;  %2160 = vrsqrt.f32 %v1594_v15  ;;  %v1528_v1 = vsub.f32 %v1464_v6, %v1496_v31  ;;  %v1577_v23 = vsub.f32 %v3025_v38, %v3418_v25  ;;  %v1764_v15 = vld [vmem:[%s3530_s7 + $0x68] sm:$0xff]  ;;  %v1779_v11 = vld [vmem:[%s3530_s7 + $0xe0] sm:$0xff] }
 0x298   : > { %2162 = vrsqrt.f32 %v1591_v10  ;;  %v1543_v26 = vsub.f32 %v1479_v54, %v1511_v63  ;;  %v1444_v12 = vpop.xlane.xlu1 %1443  ;;  %v1578_v54 = vsub.f32 %v3035_v3, %v3440_v46  ;;  %v1781_v3 = vld [vmem:[%s3530_s7 + $0xf0] sm:$0xff] }
 0x299   : > { %v1447_v57 = vpop.xlane.xlu0 %1446  ;;  %1840 = vst.msk [vmem:[%s3135_s18 + $0xc8] sm:$0xff] %vm1193_vm1, %v1808_v49  ;;  %v1592_v47 = vadd.f32 1e-05, %v1528_v1  ;;  %v1480_v39 = vmul.f32 0.010416667, %v1444_v12  ;;  %v1780_v12 = vld [vmem:[%s3530_s7 + $0xe8] sm:$0xff] }
 0x29a   : > { %v1481_v28 = vmul.f32 0.010416667, %v1447_v57  ;;  %v1607_v35 = vadd.f32 1e-05, %v1543_v26 }
 0x29b   : > { %2164 = vrsqrt.f32 %v1592_v47  ;;  %v1544_v24 = vsub.f32 %v1480_v39, %v1512_v7 }
 0x29c   : > { %v1545_v9 = vsub.f32 %v1481_v28, %v1513_v8  ;;  %2166 = vrsqrt.f32 %v1607_v35  ;;  %v1450_v19 = vpop.xlane.xlu1 %1449 }
 0x29d   : > { %v1608_v34 = vadd.f32 1e-05, %v1544_v24  ;;  %v1482_v53 = vmul.f32 0.010416667, %v1450_v19  ;;  %v1782_v24 = vld [vmem:[%s3530_s7 + $0xf8] sm:$0xff] }
 0x29e   : > { %v1609_v5 = vadd.f32 1e-05, %v1545_v9 }
 0x29f   : > { %2168 = vrsqrt.f32 %v1608_v34  ;;  %v1546_v52 = vsub.f32 %v1482_v53, %v1514_v29 }
 0x2a0   : > { %2170 = vrsqrt.f32 %v1609_v5 }
 0x2a1   : > { %v2159_v59 = vpop.eup %2158  ;;  %v1610_v56 = vadd.f32 1e-05, %v1546_v52 }
 0x2a2   : > { %v1657_v45 = vmul.f32 %v2159_v59, %v1561_v33 }
 0x2a3   : > { %2172 = vrsqrt.f32 %v1610_v56 }
 0x2a4   : > { %v2161_v14 = vpop.eup %2160  ;;  %v1695_v41 = vmul.f32 %v3112_v43, %v1657_v45 }
 0x2a5   : > { %v2163_v17 = vpop.eup %2162  ;;  %v1658_v16 = vmul.f32 %v2161_v14, %v1562_v58 }
 0x2a6   : > { %v1733_v50 = vadd.f32 %v3117_v60, %v1695_v41  ;;  %v1655_v44 = vmul.f32 %v2163_v17, %v1559_v13 }
 0x2a7   : > { %v1696_v30 = vmul.f32 %v3112_v43, %v1658_v16 }
 0x2a8   : > { %v2165_v62 = vpop.eup %2164  ;;  %v1797_v21 = vadd.f32 %v1765_v27, %v1733_v50  ;;  %v1693_v18 = vmul.f32 %v3112_v43, %v1655_v44 }
 0x2a9   : > { %v2167_v61 = vpop.eup %2166  ;;  %v1734_v4 = vadd.f32 %v3117_v60, %v1696_v30  ;;  %v1656_v55 = vmul.f32 %v2165_v62, %v1560_v36 }
 0x2aa   : > { %1829 = vst.msk [vmem:[%s3135_s18 + $0x70] sm:$0xff] %vm1193_vm1, %v1797_v21  ;;  %v1731_v0 = vadd.f32 %v3117_v60, %v1693_v18  ;;  %v1671_v40 = vmul.f32 %v2167_v61, %v1575_v2 }
 0x2ab   : > { %v1798_v51 = vadd.f32 %v1766_v37, %v1734_v4  ;;  %v1694_v31 = vmul.f32 %v3112_v43, %v1656_v55 }
 0x2ac   : > { %v2169_v20 = vpop.eup %2168  ;;  %v1795_v32 = vadd.f32 %v1763_v22, %v1731_v0  ;;  %v1709_v10 = vmul.f32 %v3112_v43, %v1671_v40 }
 0x2ad   : > { %v2171_v6 = vpop.eup %2170  ;;  %1830 = vst.msk [vmem:[%s3135_s18 + $0x78] sm:$0xff] %vm1193_vm1, %v1798_v51  ;;  %v1732_v42 = vadd.f32 %v3117_v60, %v1694_v31  ;;  %v1672_v63 = vmul.f32 %v2169_v20, %v1576_v48 }
 0x2ae   : > { %1827 = vst.msk [vmem:[%s3135_s18 + $0x60] sm:$0xff] %vm1193_vm1, %v1795_v32  ;;  %v1747_v38 = vadd.f32 %v3117_v60, %v1709_v10  ;;  %v1673_v25 = vmul.f32 %v2171_v6, %v1577_v23 }
 0x2af   : > { %v1796_v49 = vadd.f32 %v1764_v15, %v1732_v42  ;;  %v1710_v1 = vmul.f32 %v3112_v43, %v1672_v63 }
 0x2b0   : > { %v2173_v8 = vpop.eup %2172  ;;  %v1811_v26 = vadd.f32 %v1779_v11, %v1747_v38  ;;  %v1711_v57 = vmul.f32 %v3112_v43, %v1673_v25 }
 0x2b1   : > { %1828 = vst.msk [vmem:[%s3135_s18 + $0x68] sm:$0xff] %vm1193_vm1, %v1796_v49  ;;  %v1748_v7 = vadd.f32 %v3117_v60, %v1710_v1  ;;  %v1674_v46 = vmul.f32 %v2173_v8, %v1578_v54 }
 0x2b2   : > { %1843 = vst.msk [vmem:[%s3135_s18 + $0xe0] sm:$0xff] %vm1193_vm1, %v1811_v26  ;;  %v1749_v47 = vadd.f32 %v3117_v60, %v1711_v57 }
 0x2b3   : > { %v1812_v39 = vadd.f32 %v1780_v12, %v1748_v7  ;;  %v1712_v28 = vmul.f32 %v3112_v43, %v1674_v46 }
 0x2b4   : > { %v1813_v35 = vadd.f32 %v1781_v3, %v1749_v47 }
 0x2b5   : > { %1844 = vst.msk [vmem:[%s3135_s18 + $0xe8] sm:$0xff] %vm1193_vm1, %v1812_v39  ;;  %v1750_v9 = vadd.f32 %v3117_v60, %v1712_v28 }
 0x2b6   : > { %1845 = vst.msk [vmem:[%s3135_s18 + $0xf0] sm:$0xff] %vm1193_vm1, %v1813_v35 }
 0x2b7   : > { %v1814_v19 = vadd.f32 %v1782_v24, %v1750_v9 }
 0x2b9   : > { %1846 = vst.msk [vmem:[%s3135_s18 + $0xf8] sm:$0xff] %vm1193_vm1, %v1814_v19 }
 0x2ba PF: > { %s18_s27 = sadd.s32 1, %s2180_s27  }
 0x2bb   : > { %p15_p4 = scmp.ge.s32.totalorder %s18_s27, 4  }
 0x2bd   :  { %17 = sbr.rel (!%p15_p4) target bundleno = 1 (0x1), region = 82 }

</bundles_post_ra>
